<compile_context>
chip_gen: v7x
topology: tpu7x:2x2x1
jax: 0.10.0
libtpu: 0.0.40
codegen_flags: <defaults>
</compile_context>

<pallas_src>
import functools

import jax
import jax.numpy as jnp
from jax.experimental import pallas as pl
from jax.experimental.pallas import tpu as pltpu

# ----------------------------- configuration (small, consistent with module) ---
NUM_NODE_FEAT = 8        # num_node_features
NUM_EDGE_FEAT = 6        # num_edge_features
FEAT_PAD = 16            # Fn + Fe = 14, zero-padded to a sublane-aligned K
HIDDEN = 128             # gnn_hidden_size (300 in defaults; small + lane-aligned here)
FFN_HIDDEN = 128         # ffn_hidden_size
NUM_TARGETS = 1          # num_targets
OUT_PAD = 128            # lane-dense padded output width (sliced outside kernel)
GNN_DEPTH = 3            # gnn_depth (share_weights=True)
FFN_DEPTH = 3            # ffn_depth
GRAPHS_PER_TILE = 8      # molecules per grid step (multiple of 8 -> aligned sublanes)
# dropout = 0.0 (eval-equivalent, no-op), act_func = SiLU, graph_pool = 'sum'


def _silu(v):
    return v * jax.nn.sigmoid(v)


def _mm(a, b):
    """MXU matmul: bf16 operands, f32 accumulation."""
    return jnp.dot(a.astype(jnp.bfloat16), b.astype(jnp.bfloat16),
                   preferred_element_type=jnp.float32)


# ----------------------------- kernel ------------------------------------------
def molnet_kernel(edge_in_ref, msg_op_ref, scol_ref, pool_ref,
                  wei_ref, bei_ref, wconv_ref, bconv_ref,
                  w1_ref, b1_ref, w2_ref, b2_ref, w3_ref, b3_ref,
                  out_ref, *, gnn_depth):
    # Hoist loop-invariant loads out of the (unrolled) depth loop.
    msg_op = msg_op_ref[...]            # (Et, Et) bf16 : rrow @ scol - prev  (fused operator)
    wconv = wconv_ref[...]              # (H, H) bf16   : shared DMPNNConv linear

    # --- edge init: SiLU(Linear(cat([x[row], edge_attr])))  -- single padded-K matmul
    ea0 = _silu(_mm(edge_in_ref[...], wei_ref[...]) + bei_ref[...])     # (Et, H) f32

    # Hoisted residual + bias (single (1,H)->(Et,H) broadcast instead of one per depth).
    res0 = ea0 + bconv_ref[...]                                         # (Et, H) f32

    # --- DMPNN message passing (shared weights), residual with initial edge state.
    #     (msg_op @ ea)[e] == a_message[row[e]] - ea[reverse(e)]
    ea = ea0
    for _ in range(gnn_depth):
        msg = _mm(msg_op, ea)                                           # (Et, H)
        ea = _mm(msg, wconv) + res0                                     # pre-activation state
    h_act = _silu(ea)                                                   # activate last layer

    # --- edge_to_node: aggregation output of DMPNNConv, then activation
    node_h = _silu(_mm(scol_ref[...], h_act))                           # (Nt, H)

    # --- global_add_pool over this tile's graphs
    g = _mm(pool_ref[...], node_h)                                      # (Gt, H)

    # --- FFN head: Linear -> SiLU -> Linear -> SiLU -> Linear   (lane-dense output)
    f1 = _silu(_mm(g, w1_ref[...]) + b1_ref[...])
    f2 = _silu(_mm(f1, w2_ref[...]) + b2_ref[...])
    out_ref[...] = _mm(f2, w3_ref[...]) + b3_ref[...]                   # (Gt, OUT_PAD)


def _cost_estimate(n_tiles, et, nt, gt):
    h, hf = HIDDEN, FFN_HIDDEN
    flops_tile = (2 * et * FEAT_PAD * h
                  + GNN_DEPTH * (2 * et * et * h + 2 * et * h * h)
                  + 2 * nt * et * h + 2 * gt * nt * h
                  + 2 * gt * h * hf + 2 * gt * hf * hf + 2 * gt * hf * OUT_PAD)
    trans_tile = 2 * et * h + nt * h + 2 * gt * hf
    bytes_tile = 2 * (et * et + et * FEAT_PAD + nt * et + gt * nt) + 4 * gt * OUT_PAD
    weight_bytes = (2 * (FEAT_PAD * h + h * h + h * hf + hf * hf + hf * OUT_PAD)
                    + 4 * (3 * h + hf + OUT_PAD))
    return pl.CostEstimate(flops=int(n_tiles * flops_tile),
                           transcendentals=int(n_tiles * trans_tile),
                           bytes_accessed=int(n_tiles * bytes_tile + weight_bytes))


def molnet_forward(edge_in, msg_op, scol, pool, kparams):
    n_tiles, et, _ = edge_in.shape
    nt = scol.shape[1]
    gt = pool.shape[1]

    def tile3(shape):          # per-tile operator, streamed along the grid axis
        return pl.BlockSpec((None,) + shape, lambda i: (i, 0, 0))

    def resident(shape):       # weight / bias, constant index_map -> stays in VMEM
        return pl.BlockSpec(shape, lambda i: (0, 0))

    args = (edge_in, msg_op, scol, pool,
            kparams["wei"], kparams["bei"], kparams["wconv"], kparams["bconv"],
            kparams["w1"], kparams["b1"], kparams["w2"], kparams["b2"],
            kparams["w3p"], kparams["b3p"])
    in_specs = [
        tile3((et, FEAT_PAD)),                 # edge_in
        tile3((et, et)),                       # msg_op
        tile3((nt, et)),                       # scol
        tile3((gt, nt)),                       # pool
        resident((FEAT_PAD, HIDDEN)),          # wei
        resident((1, HIDDEN)),                 # bei
        resident((HIDDEN, HIDDEN)),            # wconv
        resident((1, HIDDEN)),                 # bconv
        resident((HIDDEN, FFN_HIDDEN)),        # w1
        resident((1, FFN_HIDDEN)),             # b1
        resident((FFN_HIDDEN, FFN_HIDDEN)),    # w2
        resident((1, FFN_HIDDEN)),             # b2
        resident((FFN_HIDDEN, OUT_PAD)),       # w3p
        resident((1, OUT_PAD)),                # b3p
    ]
    out = pl.pallas_call(
        functools.partial(molnet_kernel, gnn_depth=GNN_DEPTH),
        out_shape=jax.ShapeDtypeStruct((n_tiles, gt, OUT_PAD), jnp.float32),
        grid=(n_tiles,),
        in_specs=in_specs,
        out_specs=pl.BlockSpec((None, gt, OUT_PAD), lambda i: (i, 0, 0)),
        compiler_params=pltpu.CompilerParams(
            dimension_semantics=("parallel",),
            vmem_limit_bytes=48 * 1024 * 1024),
        cost_estimate=_cost_estimate(n_tiles, et, nt, gt),
    )(*args)
    # (n_tiles, Gt, OUT_PAD) -> (B, num_targets); the narrow slice stays outside the
    # kernel so the kernel's store is lane-dense.
    return out.reshape(n_tiles * gt, OUT_PAD)[:, :NUM_TARGETS]


# ----------------------------- host-side glue ----------------------------------
def make_params(key):
    ks = jax.random.split(key, 12)
    s = 0.1
    return {
        # edge_init: Linear(Fn + Fe, H), weight split along input features
        "wei_n": s * jax.random.normal(ks[0], (NUM_NODE_FEAT, HIDDEN), jnp.float32),
        "wei_e": s * jax.random.normal(ks[1], (NUM_EDGE_FEAT, HIDDEN), jnp.float32),
        "bei": s * jax.random.normal(ks[2], (1, HIDDEN), jnp.float32),
        # shared DMPNNConv linear: Linear(H, H)
        "wconv": s * jax.random.normal(ks[3], (HIDDEN, HIDDEN), jnp.float32),
        "bconv": s * jax.random.normal(ks[4], (1, HIDDEN), jnp.float32),
        # FFN (ffn_depth=3): Linear(H, Hf) -> Linear(Hf, Hf) -> Linear(Hf, T)
        "w1": s * jax.random.normal(ks[5], (HIDDEN, FFN_HIDDEN), jnp.float32),
        "b1": s * jax.random.normal(ks[6], (1, FFN_HIDDEN), jnp.float32),
        "w2": s * jax.random.normal(ks[7], (FFN_HIDDEN, FFN_HIDDEN), jnp.float32),
        "b2": s * jax.random.normal(ks[8], (1, FFN_HIDDEN), jnp.float32),
        "w3": s * jax.random.normal(ks[9], (FFN_HIDDEN, NUM_TARGETS), jnp.float32),
        "b3": s * jax.random.normal(ks[10], (1, NUM_TARGETS), jnp.float32),
    }
    # NOTE: edge_to_node (a second DMPNNConv) has a linear layer in PyTorch, but only
    # its aggregation output is used in forward, so its weights never affect the result.


def prepare_kernel_params(p):
    """bf16 MXU weights (f32 biases), fused edge-init weight, lane-padded head."""
    bf = jnp.bfloat16
    wei = jnp.concatenate(
        [p["wei_n"], p["wei_e"],
         jnp.zeros((FEAT_PAD - NUM_NODE_FEAT - NUM_EDGE_FEAT, HIDDEN), jnp.float32)],
        axis=0)                                                         # (FEAT_PAD, H)
    w3p = jnp.zeros((FFN_HIDDEN, OUT_PAD), jnp.float32).at[:, :NUM_TARGETS].set(p["w3"])
    b3p = jnp.zeros((1, OUT_PAD), jnp.float32).at[:, :NUM_TARGETS].set(p["b3"])
    return {
        "wei": wei.astype(bf), "bei": p["bei"],
        "wconv": p["wconv"].astype(bf), "bconv": p["bconv"],
        "w1": p["w1"].astype(bf), "b1": p["b1"],
        "w2": p["w2"].astype(bf), "b2": p["b2"],
        "w3p": w3p.astype(bf), "b3p": b3p,
    }


def prepare_graph_operators(x, edge_attr, row, col, batch, n_graphs, graphs_per_tile):
    """Per-tile dense structural operators (exact in bf16) + pre-gathered edge feats.

    Assumes molecules are contiguous in the batch with uniform node/edge counts
    (true for the synthetic demo); tiles group `graphs_per_tile` consecutive graphs.
    TODO(synk): ragged molecules need per-tile zero-padding of nodes/edges (padded
    rows/cols are zero in scol/pool so they cannot leak into real graphs).
    """
    N, E = x.shape[0], row.shape[0]
    assert n_graphs % graphs_per_tile == 0
    n_tiles = n_graphs // graphs_per_tile
    assert N % n_tiles == 0 and E % n_tiles == 0
    nt, et = N // n_tiles, E // n_tiles

    node_off = (jnp.arange(n_tiles, dtype=jnp.int32) * nt)[:, None]
    graph_off = (jnp.arange(n_tiles, dtype=jnp.int32) * graphs_per_tile)[:, None]
    row_t = row.reshape(n_tiles, et) - node_off
    col_t = col.reshape(n_tiles, et) - node_off
    batch_t = batch.reshape(n_tiles, nt) - graph_off
    x_t = x.reshape(n_tiles, nt, -1)
    ea_t = edge_attr.reshape(n_tiles, et, -1)

    def build_tile(x_i, ea_i, row_i, col_i, batch_i):
        rrow = jax.nn.one_hot(row_i, nt, dtype=jnp.float32)             # (et, nt) gather x[row]
        scol = jax.nn.one_hot(col_i, nt, dtype=jnp.float32).T           # (nt, et) scatter-add @ col
        rev_idx = jnp.arange(et, dtype=jnp.int32) ^ 1                   # consecutive pair swap
        prev = jax.nn.one_hot(rev_idx, et, dtype=jnp.float32)           # (et, et) reverse perm
        # Fused DMPNN message operator:  (msg_op @ ea)[e] = a_msg[row[e]] - ea[rev(e)]
        msg_op = rrow @ scol - prev                                     # small-integer entries
        pool = jax.nn.one_hot(batch_i, graphs_per_tile, dtype=jnp.float32).T  # (Gt, nt)
        feat = jnp.concatenate([x_i[row_i], ea_i], axis=1)
        feat = jnp.pad(feat, ((0, 0), (0, FEAT_PAD - feat.shape[1])))
        return (feat.astype(jnp.bfloat16), msg_op.astype(jnp.bfloat16),
                scol.astype(jnp.bfloat16), pool.astype(jnp.bfloat16))

    return jax.vmap(build_tile)(x_t, ea_t, row_t, col_t, batch_t)


# ----------------------------- references --------------------------------------
def molnet_reference_mirrored(edge_in, msg_op, scol, pool, kp):
    """Plain-JAX reference with identical math/dtypes to the kernel (vmapped tiles)."""
    def one_tile(ei, mo, sc, po):
        ea0 = jax.nn.silu(_mm(ei, kp["wei"]) + kp["bei"])
        res0 = ea0 + kp["bconv"]
        ea = ea0
        for _ in range(GNN_DEPTH):
            ea = _mm(_mm(mo, ea), kp["wconv"]) + res0
        node_h = jax.nn.silu(_mm(sc, jax.nn.silu(ea)))
        g = _mm(po, node_h)
        f1 = jax.nn.silu(_mm(g, kp["w1"]) + kp["b1"])
        f2 = jax.nn.silu(_mm(f1, kp["w2"]) + kp["b2"])
        return _mm(f2, kp["w3p"]) + kp["b3p"]

    out = jax.vmap(one_tile)(edge_in, msg_op, scol, pool)
    return out.reshape(-1, OUT_PAD)[:, :NUM_TARGETS]


def molnet_reference_f32(x, edge_attr, row, col, batch, n_graphs, p):
    """Unfolded pure-f32 semantic reference (scatter/gather form, no operator folding)."""
    N, E = x.shape[0], row.shape[0]
    rev = jnp.arange(E, dtype=jnp.int32) ^ 1
    wei = jnp.concatenate([p["wei_n"], p["wei_e"]], axis=0)
    ea0 = jax.nn.silu(jnp.concatenate([x[row], edge_attr], axis=1) @ wei + p["bei"])
    ea = ea0
    for _ in range(GNN_DEPTH):
        a_msg = jax.ops.segment_sum(ea, col, num_segments=N)
        ea = (a_msg[row] - ea[rev]) @ p["wconv"] + p["bconv"] + ea0
    h_act = jax.nn.silu(ea)
    node_h = jax.nn.silu(jax.ops.segment_sum(h_act, col, num_segments=N))
    g = jax.ops.segment_sum(node_h, batch, num_segments=n_graphs)
    f1 = jax.nn.silu(g @ p["w1"] + p["b1"])
    f2 = jax.nn.silu(f1 @ p["w2"] + p["b2"])
    return f2 @ p["w3"] + p["b3"]


if __name__ == "__main__":
    key = jax.random.PRNGKey(0)
    k_x, k_e, k_p = jax.random.split(key, 3)

    # --- small synthetic batched graph: 16 graphs x 8 nodes, ring topology ---
    n_nodes_per_graph, n_graphs = 8, 16
    N = n_nodes_per_graph * n_graphs                      # 128 nodes
    undirected = []
    for g in range(n_graphs):
        base = g * n_nodes_per_graph
        for i in range(n_nodes_per_graph):
            undirected.append((base + i, base + (i + 1) % n_nodes_per_graph))
    # directed edges stored as consecutive (u->v, v->u) pairs (DMPNN convention)
    row_l, col_l = [], []
    for (u, v) in undirected:
        row_l += [u, v]
        col_l += [v, u]
    E = len(row_l)                                        # 256 edges
    row = jnp.array(row_l, dtype=jnp.int32)
    col = jnp.array(col_l, dtype=jnp.int32)
    batch = jnp.array([g for g in range(n_graphs) for _ in range(n_nodes_per_graph)],
                      dtype=jnp.int32)

    x = jax.random.normal(k_x, (N, NUM_NODE_FEAT), jnp.float32)
    edge_attr = jax.random.normal(k_e, (E, NUM_EDGE_FEAT), jnp.float32)

    params = make_params(k_p)
    kparams = prepare_kernel_params(params)
    edge_in, msg_op, scol_bf, pool_bf = prepare_graph_operators(
        x, edge_attr, row, col, batch, n_graphs, GRAPHS_PER_TILE)

    out = molnet_forward(edge_in, msg_op, scol_bf, pool_bf, kparams)
    out = jax.block_until_ready(out)
    assert out.shape == (n_graphs, NUM_TARGETS), out.shape

    # exact-path check (same bf16/f32 math as the kernel)
    ref_bf = molnet_reference_mirrored(edge_in, msg_op, scol_bf, pool_bf, kparams)
    assert jnp.allclose(out, ref_bf, rtol=2e-3, atol=2e-3), (out, ref_bf)

    # semantic check vs. the unfolded pure-f32 gather/scatter formulation
    ref_f32 = molnet_reference_f32(x, edge_attr, row, col, batch, n_graphs, params)
    rel = float(jnp.max(jnp.abs(out - ref_f32)) / (jnp.max(jnp.abs(ref_f32)) + 1e-6))
    assert rel < 5e-2, (rel, out, ref_f32)

    print("KERNEL_OK")
</pallas_src>

<mosaic_0001>
module attributes {stable_mosaic.version = 11 : i64} {
  func.func @molnet_kernel(%arg0: i32, %arg1: memref<1x128x16xbf16, #tpu.memory_space<vmem>>, %arg2: memref<1x128x128xbf16, #tpu.memory_space<vmem>>, %arg3: memref<1x64x128xbf16, #tpu.memory_space<vmem>>, %arg4: memref<1x8x64xbf16, #tpu.memory_space<vmem>>, %arg5: memref<16x128xbf16, #tpu.memory_space<vmem>>, %arg6: memref<1x128xf32, #tpu.memory_space<vmem>>, %arg7: memref<128x128xbf16, #tpu.memory_space<vmem>>, %arg8: memref<1x128xf32, #tpu.memory_space<vmem>>, %arg9: memref<128x128xbf16, #tpu.memory_space<vmem>>, %arg10: memref<1x128xf32, #tpu.memory_space<vmem>>, %arg11: memref<128x128xbf16, #tpu.memory_space<vmem>>, %arg12: memref<1x128xf32, #tpu.memory_space<vmem>>, %arg13: memref<128x128xbf16, #tpu.memory_space<vmem>>, %arg14: memref<1x128xf32, #tpu.memory_space<vmem>>, %arg15: memref<1x8x128xf32, #tpu.memory_space<vmem>>) attributes {dimension_semantics = [#tpu.dimension_semantics<parallel>], iteration_bounds = array<i64: 2>, scalar_prefetch = 0 : i64, scratch_operands = 0 : i64, tpu.core_type = #tpu.core_type<tc>, window_params = [{transform_indices = @transform_0, window_bounds = array<i64: 1, 128, 16>}, {transform_indices = @transform_1, window_bounds = array<i64: 1, 128, 128>}, {transform_indices = @transform_2, window_bounds = array<i64: 1, 64, 128>}, {transform_indices = @transform_3, window_bounds = array<i64: 1, 8, 64>}, {pipeline_mode = #tpu.pipeline_mode<synchronous>, transform_indices = @transform_4, window_bounds = array<i64: 16, 128>}, {pipeline_mode = #tpu.pipeline_mode<synchronous>, transform_indices = @transform_5, window_bounds = array<i64: 1, 128>}, {pipeline_mode = #tpu.pipeline_mode<synchronous>, transform_indices = @transform_6, window_bounds = array<i64: 128, 128>}, {pipeline_mode = #tpu.pipeline_mode<synchronous>, transform_indices = @transform_7, window_bounds = array<i64: 1, 128>}, {pipeline_mode = #tpu.pipeline_mode<synchronous>, transform_indices = @transform_8, window_bounds = array<i64: 128, 128>}, {pipeline_mode = #tpu.pipeline_mode<synchronous>, transform_indices = @transform_9, window_bounds = array<i64: 1, 128>}, {pipeline_mode = #tpu.pipeline_mode<synchronous>, transform_indices = @transform_10, window_bounds = array<i64: 128, 128>}, {pipeline_mode = #tpu.pipeline_mode<synchronous>, transform_indices = @transform_11, window_bounds = array<i64: 1, 128>}, {pipeline_mode = #tpu.pipeline_mode<synchronous>, transform_indices = @transform_12, window_bounds = array<i64: 128, 128>}, {pipeline_mode = #tpu.pipeline_mode<synchronous>, transform_indices = @transform_13, window_bounds = array<i64: 1, 128>}, {transform_indices = @transform_14, window_bounds = array<i64: 1, 8, 128>}]} {
    %c0 = arith.constant 0 : index
    %c0_0 = arith.constant 0 : index
    %c0_1 = arith.constant 0 : index
    %0 = vector.load %arg2[%c0, %c0_0, %c0_1] : memref<1x128x128xbf16, #tpu.memory_space<vmem>>, vector<1x128x128xbf16>
    %1 = vector.shape_cast %0 : vector<1x128x128xbf16> to vector<128x128xbf16>
    %c0_2 = arith.constant 0 : index
    %c0_3 = arith.constant 0 : index
    %2 = vector.load %arg7[%c0_2, %c0_3] : memref<128x128xbf16, #tpu.memory_space<vmem>>, vector<128x128xbf16>
    %c0_4 = arith.constant 0 : index
    %c0_5 = arith.constant 0 : index
    %c0_6 = arith.constant 0 : index
    %3 = vector.load %arg1[%c0_4, %c0_5, %c0_6] : memref<1x128x16xbf16, #tpu.memory_space<vmem>>, vector<1x128x16xbf16>
    %4 = vector.shape_cast %3 : vector<1x128x16xbf16> to vector<128x16xbf16>
    %c0_7 = arith.constant 0 : index
    %c0_8 = arith.constant 0 : index
    %5 = vector.load %arg5[%c0_7, %c0_8] : memref<16x128xbf16, #tpu.memory_space<vmem>>, vector<16x128xbf16>
    %cst = arith.constant dense<0.000000e+00> : vector<128x128xf32>
    %6 = tpu.matmul %4, %5, %cst {dimension_numbers = #tpu.dot_dimension_numbers<[1], [0], [0], [1], [0, 0, 1, 1], [], []>} : vector<128x16xbf16>, vector<16x128xbf16>, vector<128x128xf32> -> vector<128x128xf32>
    %c0_9 = arith.constant 0 : index
    %c0_10 = arith.constant 0 : index
    %7 = vector.load %arg6[%c0_9, %c0_10] : memref<1x128xf32, #tpu.memory_space<vmem>>, vector<1x128xf32>
    %8 = vector.broadcast %7 : vector<1x128xf32> to vector<128x128xf32>
    %9 = arith.addf %6, %8 : vector<128x128xf32>
    %10 = arith.negf %9 : vector<128x128xf32>
    %11 = math.exp %10 : vector<128x128xf32>
    %cst_11 = arith.constant 1.000000e+00 : f32
    %12 = vector.broadcast %cst_11 : f32 to vector<128x128xf32>
    %13 = arith.addf %12, %11 : vector<128x128xf32>
    %14 = arith.divf %12, %13 : vector<128x128xf32>
    %15 = arith.mulf %9, %14 : vector<128x128xf32>
    %c0_12 = arith.constant 0 : index
    %c0_13 = arith.constant 0 : index
    %16 = vector.load %arg8[%c0_12, %c0_13] : memref<1x128xf32, #tpu.memory_space<vmem>>, vector<1x128xf32>
    %17 = vector.broadcast %16 : vector<1x128xf32> to vector<128x128xf32>
    %18 = arith.addf %15, %17 : vector<128x128xf32>
    %19 = arith.truncf %15 : vector<128x128xf32> to vector<128x128xbf16>
    %cst_14 = arith.constant dense<0.000000e+00> : vector<128x128xf32>
    %20 = tpu.matmul %1, %19, %cst_14 {dimension_numbers = #tpu.dot_dimension_numbers<[1], [0], [0], [1], [0, 0, 1, 1], [], []>} : vector<128x128xbf16>, vector<128x128xbf16>, vector<128x128xf32> -> vector<128x128xf32>
    %21 = arith.truncf %20 : vector<128x128xf32> to vector<128x128xbf16>
    %cst_15 = arith.constant dense<0.000000e+00> : vector<128x128xf32>
    %22 = tpu.matmul %21, %2, %cst_15 {dimension_numbers = #tpu.dot_dimension_numbers<[1], [0], [0], [1], [0, 0, 1, 1], [], []>} : vector<128x128xbf16>, vector<128x128xbf16>, vector<128x128xf32> -> vector<128x128xf32>
    %23 = arith.addf %22, %18 : vector<128x128xf32>
    %24 = arith.truncf %23 : vector<128x128xf32> to vector<128x128xbf16>
    %cst_16 = arith.constant dense<0.000000e+00> : vector<128x128xf32>
    %25 = tpu.matmul %1, %24, %cst_16 {dimension_numbers = #tpu.dot_dimension_numbers<[1], [0], [0], [1], [0, 0, 1, 1], [], []>} : vector<128x128xbf16>, vector<128x128xbf16>, vector<128x128xf32> -> vector<128x128xf32>
    %26 = arith.truncf %25 : vector<128x128xf32> to vector<128x128xbf16>
    %cst_17 = arith.constant dense<0.000000e+00> : vector<128x128xf32>
    %27 = tpu.matmul %26, %2, %cst_17 {dimension_numbers = #tpu.dot_dimension_numbers<[1], [0], [0], [1], [0, 0, 1, 1], [], []>} : vector<128x128xbf16>, vector<128x128xbf16>, vector<128x128xf32> -> vector<128x128xf32>
    %28 = arith.addf %27, %18 : vector<128x128xf32>
    %29 = arith.truncf %28 : vector<128x128xf32> to vector<128x128xbf16>
    %cst_18 = arith.constant dense<0.000000e+00> : vector<128x128xf32>
    %30 = tpu.matmul %1, %29, %cst_18 {dimension_numbers = #tpu.dot_dimension_numbers<[1], [0], [0], [1], [0, 0, 1, 1], [], []>} : vector<128x128xbf16>, vector<128x128xbf16>, vector<128x128xf32> -> vector<128x128xf32>
    %31 = arith.truncf %30 : vector<128x128xf32> to vector<128x128xbf16>
    %cst_19 = arith.constant dense<0.000000e+00> : vector<128x128xf32>
    %32 = tpu.matmul %31, %2, %cst_19 {dimension_numbers = #tpu.dot_dimension_numbers<[1], [0], [0], [1], [0, 0, 1, 1], [], []>} : vector<128x128xbf16>, vector<128x128xbf16>, vector<128x128xf32> -> vector<128x128xf32>
    %33 = arith.addf %32, %18 : vector<128x128xf32>
    %34 = arith.negf %33 : vector<128x128xf32>
    %35 = math.exp %34 : vector<128x128xf32>
    %cst_20 = arith.constant 1.000000e+00 : f32
    %36 = vector.broadcast %cst_20 : f32 to vector<128x128xf32>
    %37 = arith.addf %36, %35 : vector<128x128xf32>
    %38 = arith.divf %36, %37 : vector<128x128xf32>
    %39 = arith.mulf %33, %38 : vector<128x128xf32>
    %c0_21 = arith.constant 0 : index
    %c0_22 = arith.constant 0 : index
    %c0_23 = arith.constant 0 : index
    %40 = vector.load %arg3[%c0_21, %c0_22, %c0_23] : memref<1x64x128xbf16, #tpu.memory_space<vmem>>, vector<1x64x128xbf16>
    %41 = vector.shape_cast %40 : vector<1x64x128xbf16> to vector<64x128xbf16>
    %42 = arith.truncf %39 : vector<128x128xf32> to vector<128x128xbf16>
    %cst_24 = arith.constant dense<0.000000e+00> : vector<64x128xf32>
    %43 = tpu.matmul %41, %42, %cst_24 {dimension_numbers = #tpu.dot_dimension_numbers<[1], [0], [0], [1], [0, 0, 1, 1], [], []>} : vector<64x128xbf16>, vector<128x128xbf16>, vector<64x128xf32> -> vector<64x128xf32>
    %44 = arith.negf %43 : vector<64x128xf32>
    %45 = math.exp %44 : vector<64x128xf32>
    %cst_25 = arith.constant 1.000000e+00 : f32
    %46 = vector.broadcast %cst_25 : f32 to vector<64x128xf32>
    %47 = arith.addf %46, %45 : vector<64x128xf32>
    %48 = arith.divf %46, %47 : vector<64x128xf32>
    %49 = arith.mulf %43, %48 : vector<64x128xf32>
    %c0_26 = arith.constant 0 : index
    %c0_27 = arith.constant 0 : index
    %c0_28 = arith.constant 0 : index
    %50 = vector.load %arg4[%c0_26, %c0_27, %c0_28] : memref<1x8x64xbf16, #tpu.memory_space<vmem>>, vector<1x8x64xbf16>
    %51 = vector.shape_cast %50 : vector<1x8x64xbf16> to vector<8x64xbf16>
    %52 = arith.truncf %49 : vector<64x128xf32> to vector<64x128xbf16>
    %cst_29 = arith.constant dense<0.000000e+00> : vector<8x128xf32>
    %53 = tpu.matmul %51, %52, %cst_29 {dimension_numbers = #tpu.dot_dimension_numbers<[1], [0], [0], [1], [0, 0, 1, 1], [], []>} : vector<8x64xbf16>, vector<64x128xbf16>, vector<8x128xf32> -> vector<8x128xf32>
    %c0_30 = arith.constant 0 : index
    %c0_31 = arith.constant 0 : index
    %54 = vector.load %arg9[%c0_30, %c0_31] : memref<128x128xbf16, #tpu.memory_space<vmem>>, vector<128x128xbf16>
    %55 = arith.truncf %53 : vector<8x128xf32> to vector<8x128xbf16>
    %cst_32 = arith.constant dense<0.000000e+00> : vector<8x128xf32>
    %56 = tpu.matmul %55, %54, %cst_32 {dimension_numbers = #tpu.dot_dimension_numbers<[1], [0], [0], [1], [0, 0, 1, 1], [], []>} : vector<8x128xbf16>, vector<128x128xbf16>, vector<8x128xf32> -> vector<8x128xf32>
    %c0_33 = arith.constant 0 : index
    %c0_34 = arith.constant 0 : index
    %57 = vector.load %arg10[%c0_33, %c0_34] : memref<1x128xf32, #tpu.memory_space<vmem>>, vector<1x128xf32>
    %58 = vector.broadcast %57 : vector<1x128xf32> to vector<8x128xf32>
    %59 = arith.addf %56, %58 : vector<8x128xf32>
    %60 = arith.negf %59 : vector<8x128xf32>
    %61 = math.exp %60 : vector<8x128xf32>
    %cst_35 = arith.constant 1.000000e+00 : f32
    %62 = vector.broadcast %cst_35 : f32 to vector<8x128xf32>
    %63 = arith.addf %62, %61 : vector<8x128xf32>
    %64 = arith.divf %62, %63 : vector<8x128xf32>
    %65 = arith.mulf %59, %64 : vector<8x128xf32>
    %c0_36 = arith.constant 0 : index
    %c0_37 = arith.constant 0 : index
    %66 = vector.load %arg11[%c0_36, %c0_37] : memref<128x128xbf16, #tpu.memory_space<vmem>>, vector<128x128xbf16>
    %67 = arith.truncf %65 : vector<8x128xf32> to vector<8x128xbf16>
    %cst_38 = arith.constant dense<0.000000e+00> : vector<8x128xf32>
    %68 = tpu.matmul %67, %66, %cst_38 {dimension_numbers = #tpu.dot_dimension_numbers<[1], [0], [0], [1], [0, 0, 1, 1], [], []>} : vector<8x128xbf16>, vector<128x128xbf16>, vector<8x128xf32> -> vector<8x128xf32>
    %c0_39 = arith.constant 0 : index
    %c0_40 = arith.constant 0 : index
    %69 = vector.load %arg12[%c0_39, %c0_40] : memref<1x128xf32, #tpu.memory_space<vmem>>, vector<1x128xf32>
    %70 = vector.broadcast %69 : vector<1x128xf32> to vector<8x128xf32>
    %71 = arith.addf %68, %70 : vector<8x128xf32>
    %72 = arith.negf %71 : vector<8x128xf32>
    %73 = math.exp %72 : vector<8x128xf32>
    %cst_41 = arith.constant 1.000000e+00 : f32
    %74 = vector.broadcast %cst_41 : f32 to vector<8x128xf32>
    %75 = arith.addf %74, %73 : vector<8x128xf32>
    %76 = arith.divf %74, %75 : vector<8x128xf32>
    %77 = arith.mulf %71, %76 : vector<8x128xf32>
    %c0_42 = arith.constant 0 : index
    %c0_43 = arith.constant 0 : index
    %78 = vector.load %arg13[%c0_42, %c0_43] : memref<128x128xbf16, #tpu.memory_space<vmem>>, vector<128x128xbf16>
    %79 = arith.truncf %77 : vector<8x128xf32> to vector<8x128xbf16>
    %cst_44 = arith.constant dense<0.000000e+00> : vector<8x128xf32>
    %80 = tpu.matmul %79, %78, %cst_44 {dimension_numbers = #tpu.dot_dimension_numbers<[1], [0], [0], [1], [0, 0, 1, 1], [], []>} : vector<8x128xbf16>, vector<128x128xbf16>, vector<8x128xf32> -> vector<8x128xf32>
    %c0_45 = arith.constant 0 : index
    %c0_46 = arith.constant 0 : index
    %81 = vector.load %arg14[%c0_45, %c0_46] : memref<1x128xf32, #tpu.memory_space<vmem>>, vector<1x128xf32>
    %82 = vector.broadcast %81 : vector<1x128xf32> to vector<8x128xf32>
    %83 = arith.addf %80, %82 : vector<8x128xf32>
    %c0_47 = arith.constant 0 : index
    %c0_48 = arith.constant 0 : index
    %c0_49 = arith.constant 0 : index
    %84 = vector.load %arg15[%c0_47, %c0_48, %c0_49] : memref<1x8x128xf32, #tpu.memory_space<vmem>>, vector<1x8x128xf32>
    %85 = vector.shape_cast %84 : vector<1x8x128xf32> to vector<8x128xf32>
    %86 = vector.shape_cast %83 : vector<8x128xf32> to vector<1x8x128xf32>
    tpu.vector_store %arg15[%c0_47, %c0_48, %c0_49], %86 {strides = array<i32>} : memref<1x8x128xf32, #tpu.memory_space<vmem>>, vector<1x8x128xf32>,
    return
  }
  func.func @transform_0(%arg0: i32) -> (i32, i32, i32) {
    %c0_i32 = arith.constant 0 : i32
    %c0_i32_0 = arith.constant 0 : i32
    %c0_i32_1 = arith.constant 0 : i32
    return %arg0, %c0_i32, %c0_i32_0 : i32, i32, i32
  }
  func.func @transform_1(%arg0: i32) -> (i32, i32, i32) {
    %c0_i32 = arith.constant 0 : i32
    %c0_i32_0 = arith.constant 0 : i32
    %c0_i32_1 = arith.constant 0 : i32
    return %arg0, %c0_i32, %c0_i32_0 : i32, i32, i32
  }
  func.func @transform_2(%arg0: i32) -> (i32, i32, i32) {
    %c0_i32 = arith.constant 0 : i32
    %c0_i32_0 = arith.constant 0 : i32
    %c0_i32_1 = arith.constant 0 : i32
    return %arg0, %c0_i32, %c0_i32_0 : i32, i32, i32
  }
  func.func @transform_3(%arg0: i32) -> (i32, i32, i32) {
    %c0_i32 = arith.constant 0 : i32
    %c0_i32_0 = arith.constant 0 : i32
    %c0_i32_1 = arith.constant 0 : i32
    return %arg0, %c0_i32, %c0_i32_0 : i32, i32, i32
  }
  func.func @transform_4(%arg0: i32) -> (i32, i32) {
    %c0_i32 = arith.constant 0 : i32
    %c0_i32_0 = arith.constant 0 : i32
    %c0_i32_1 = arith.constant 0 : i32
    return %c0_i32, %c0_i32_0 : i32, i32
  }
  func.func @transform_5(%arg0: i32) -> (i32, i32) {
    %c0_i32 = arith.constant 0 : i32
    %c0_i32_0 = arith.constant 0 : i32
    %c0_i32_1 = arith.constant 0 : i32
    return %c0_i32, %c0_i32_0 : i32, i32
  }
  func.func @transform_6(%arg0: i32) -> (i32, i32) {
    %c0_i32 = arith.constant 0 : i32
    %c0_i32_0 = arith.constant 0 : i32
    %c0_i32_1 = arith.constant 0 : i32
    return %c0_i32, %c0_i32_0 : i32, i32
  }
  func.func @transform_7(%arg0: i32) -> (i32, i32) {
    %c0_i32 = arith.constant 0 : i32
    %c0_i32_0 = arith.constant 0 : i32
    %c0_i32_1 = arith.constant 0 : i32
    return %c0_i32, %c0_i32_0 : i32, i32
  }
  func.func @transform_8(%arg0: i32) -> (i32, i32) {
    %c0_i32 = arith.constant 0 : i32
    %c0_i32_0 = arith.constant 0 : i32
    %c0_i32_1 = arith.constant 0 : i32
    return %c0_i32, %c0_i32_0 : i32, i32
  }
  func.func @transform_9(%arg0: i32) -> (i32, i32) {
    %c0_i32 = arith.constant 0 : i32
    %c0_i32_0 = arith.constant 0 : i32
    %c0_i32_1 = arith.constant 0 : i32
    return %c0_i32, %c0_i32_0 : i32, i32
  }
  func.func @transform_10(%arg0: i32) -> (i32, i32) {
    %c0_i32 = arith.constant 0 : i32
    %c0_i32_0 = arith.constant 0 : i32
    %c0_i32_1 = arith.constant 0 : i32
    return %c0_i32, %c0_i32_0 : i32, i32
  }
  func.func @transform_11(%arg0: i32) -> (i32, i32) {
    %c0_i32 = arith.constant 0 : i32
    %c0_i32_0 = arith.constant 0 : i32
    %c0_i32_1 = arith.constant 0 : i32
    return %c0_i32, %c0_i32_0 : i32, i32
  }
  func.func @transform_12(%arg0: i32) -> (i32, i32) {
    %c0_i32 = arith.constant 0 : i32
    %c0_i32_0 = arith.constant 0 : i32
    %c0_i32_1 = arith.constant 0 : i32
    return %c0_i32, %c0_i32_0 : i32, i32
  }
  func.func @transform_13(%arg0: i32) -> (i32, i32) {
    %c0_i32 = arith.constant 0 : i32
    %c0_i32_0 = arith.constant 0 : i32
    %c0_i32_1 = arith.constant 0 : i32
    return %c0_i32, %c0_i32_0 : i32, i32
  }
  func.func @transform_14(%arg0: i32) -> (i32, i32, i32) {
    %c0_i32 = arith.constant 0 : i32
    %c0_i32_0 = arith.constant 0 : i32
    %c0_i32_1 = arith.constant 0 : i32
    return %arg0, %c0_i32, %c0_i32_0 : i32, i32, i32
  }
}

</mosaic_0001>

<bundles_post_ra>
// kernel: tpu_custom_call.1
= control target key start
LH: loop header
LB: loop body
LE: loop exit
PB: predicated region body
PF: predicated region fallthrough
CT: control target
= control target key end

     0   :  { %s4505_s0 = inlined_call_operand.vmem [shape: bf16[2,128,16], index: 0, kind: input, shape index: {}]   ;;  %s4506_s1 = inlined_call_operand.vmem [shape: bf16[2,128,128], index: 1, kind: input, shape index: {}]   ;;  %s4507_s2 = inlined_call_operand.hbm [shape: bf16[2,64,128], index: 2, kind: input, shape index: {}]   ;;  %s4508_s3 = inlined_call_operand.vmem [shape: bf16[2,8,64], index: 3, kind: input, shape index: {}]   ;;  %s4509_s4 = inlined_call_operand.vmem [shape: bf16[16,128], index: 4, kind: input, shape index: {}]   ;;  %s4510_s5 = inlined_call_operand.vmem [shape: f32[1,128], index: 5, kind: input, shape index: {}]   ;;  %s4511_s6 = inlined_call_operand.hbm [shape: bf16[128,128], index: 6, kind: input, shape index: {}]   ;;  %s4512_s7 = inlined_call_operand.vmem [shape: f32[1,128], index: 7, kind: input, shape index: {}]   ;;  %s4513_s8 = inlined_call_operand.hbm [shape: bf16[128,128], index: 8, kind: input, shape index: {}]   ;;  %s4514_s9 = inlined_call_operand.vmem [shape: f32[1,128], index: 9, kind: input, shape index: {}]   ;;  %s4515_s10 = inlined_call_operand.hbm [shape: bf16[128,128], index: 10, kind: input, shape index: {}]   ;;  %s4516_s11 = inlined_call_operand.vmem [shape: f32[1,128], index: 11, kind: input, shape index: {}]   ;;  %s4517_s12 = inlined_call_operand.hbm [shape: bf16[128,128], index: 12, kind: input, shape index: {}]   ;;  %s4518_s13 = inlined_call_operand.vmem [shape: f32[1,128], index: 13, kind: input, shape index: {}]   ;;  %s4519_s14 = inlined_call_operand.hbm [shape: f32[2,8,128], index: 14, kind: output, shape index: {}]  }
   0x1   :  { %4526 = sst [smem:[#allocation18_spill]] %s4508_s3 }
   0x2   :  { %4527 = sst [smem:[#allocation19_spill]] %s4512_s7 }
   0x3   :  { %4528 = sst [smem:[#allocation20_spill]] %s4514_s9 }
   0x4   :  { %4529 = sst [smem:[#allocation21_spill]] %s4516_s11 }
   0x5   :  { %4530 = sst [smem:[#allocation22_spill]] %s4518_s13 }
   0x6   :  { %4531 = sst [smem:[#allocation23_spill]] %s4519_s14 }
   0x7   :  { %19 = vsyncpa [#allocation3], 0 }
   0x8   :  { %21 = vsyncpa [#allocation3 + $0x1], 0 }
   0x9   :  { %22 = vsyncpa [#allocation6], 0 }
   0xa   :  { %23 = vsyncpa [#allocation9], 0 }
   0xb   :  { %24 = vsyncpa [#allocation4], 0 }
   0xc   :  { %26 = vsyncpa [#allocation4 + $0x1], 0  ;;  %s3727_s29 = smov 0   ;;  %s3729_s30 = smov 0  }
   0xd   :  { %s3731_s15 = smov 0   ;;  %s3733_s16 = smov 0  }
   0xe LB: > { %4532 = sst [smem:[#allocation16_spill]] %s3628_s29  ;;  %s3748_s17 = sadd.s32 4294967295, %s3640_s16   ;;  %s3640_s16 = sphi %s3733_s16, %s4561_s16   ;;  %s3636_s15 = sphi %s3731_s15, %s4560_s15   ;;  %s3632_s30 = sphi %s3729_s30, %s4559_s30   ;;  %s3628_s29 = sphi %s3727_s29, %s4558_s29  }
   0xf   : > { %s2519_s18 = sadd.s32 4294967294, %s3640_s16   ;;  %p104_p0 = scmp.ne.s32.totalorder %s3632_s30, %s3628_s29 }
  0x10   : > { %p4523_p1 = scmp.eq.s32.totalorder %s3748_s17, 0  ;;  %p370_p3 = scmp.eq.s32.totalorder %s2519_s18, 1 }
  0x11   : > { %p2520_p5 = scmp.ge.s32.totalorder %s3640_s16, 1  ;;  %p377_p7 = scmp.lt.s32.totalorder %s3640_s16, 3 }
  0x12   : > { %p3757_p4 = por %p4523_p1, %p104_p0  ;;  %p3762_p6 = por %p370_p3, %p104_p0 }
  0x13   : > { %p3767_p8 = pnand %p2520_p5, %p377_p7  ;;  %s3642_s22 = smov [#allocation5]  }
  0x14   : > { %s4533_s19 = scalar_select %p3757_p4, 1, 0 }
  0x15   : > { %s4534_s20 = scalar_select %p3762_p6, 1, 0 }
  0x16   : > { %s4536_s21 = scalar_select %p3767_p8, 1, 0 }
  0x17   : > { %4535 = sst [smem:[#allocation17_spill]] %s4534_s20  ;;  %s395_s23 = sshll.u32 %s3642_s22, 4  ;;  %s3771_s23 = int_to_ptr.vmem [resolvable:$true] %s395_s23 }
  0x18   : > { %p3132_p9 = pneg %p3767_p8  ;;  %s3643_s25 = smov [#allocation8]  }
  0x19   : > { %s427_s26 = sshll.u32 %s3643_s25, 4  ;;  %s3644_s27 = smov [#allocation7]   ;;  %s3782_s26 = int_to_ptr.vmem [resolvable:$true] %s427_s26 }
  0x1a   : > { %p3778_p11 = pnand %p3132_p9, %p4523_p1  ;;  %s3784_s28 = sshll.u32 %s3644_s27, 4  ;;  %s412_s28 = int_to_ptr.vmem [resolvable:$true] %s3784_s28 }
  0x1b   : > { %s3424_s20 = scalar_lea.hbm %s4511_s6, 1024 }
  0x1c   : > { %p3425_p12 = scmp.ne.s32.totalorder %s4511_s6, %s3424_s20  ;;  %p3794_p13 = pneg %p3778_p11 }
  0x1d   : > { %p3431_p5 = scmp.lt.u32.totalorder %s3424_s20, %s4511_s6 }
  0x1e   : > { %p3427_p0 = pnand %p3794_p13, %p3425_p12 }
  0x20   : > { %p3428_p3 = pneg %p3427_p0 }
  0x22   : > { %p3433_p7 = pnand %p3431_p5, %p3428_p3 }
  0x24   : > { %3436 = shalt.err (!%p3433_p7)
}
  0x25   : > { %s3437_s14 = scalar_lea.vmem %s3771_s23, 1024  ;;  %p3445_p2 = scmp.lt.s32.totalorder %s3771_s23, %s3771_s23 }
  0x26   : > { %p3438_p9 = scmp.ne.s32.totalorder %s3771_s23, %s3437_s14  ;;  %p3446_p6 = scmp.lt.s32.totalorder %s3437_s14, %s3437_s14 }
  0x28   : > { %p3440_p10 = pnand %p3438_p9, %p3794_p13  ;;  %p3447_p12 = por %p3446_p6, %p3445_p2 }
  0x2a   : > { %p3441_p1 = pneg %p3440_p10 }
  0x2c   : > { %p3448_p0 = pnand %p3447_p12, %p3441_p1 }
  0x2e   : > { %3451 = shalt.err (!%p3448_p0)
}
  0x2f   : > { %s3645_s29 = smov 64   ;;  %s3646_s20 = smov 4  }
  0x30   : > { %3135 = dma.hbm_to_vmem [thread:$0]  (!%p3778_p11), %s4511_s6, 1024, %s3771_s23, [#allocation6], %s3645_s29, %s3645_s29, %s3646_s20  }
  0x31   : > { %s3452_s14 = scalar_lea.hbm %s4515_s10, 1024 }
  0x32   : > { %p3453_p1 = scmp.ne.s32.totalorder %s4515_s10, %s3452_s14  ;;  %p3459_p10 = scmp.lt.u32.totalorder %s3452_s14, %s4515_s10 }
  0x34   : > { %p3455_p2 = pnand %p3453_p1, %p3794_p13 }
  0x36   : > { %p3456_p6 = pneg %p3455_p2 }
  0x38   : > { %p3461_p3 = pnand %p3459_p10, %p3456_p6 }
  0x3a   : > { %3464 = shalt.err (!%p3461_p3)
}
  0x3b   : > { %s3465_s23 = scalar_lea.vmem %s3782_s26, 1024  ;;  %p3473_p12 = scmp.lt.s32.totalorder %s3782_s26, %s3782_s26 }
  0x3c   : > { %p3466_p5 = scmp.ne.s32.totalorder %s3782_s26, %s3465_s23  ;;  %p3474_p0 = scmp.lt.s32.totalorder %s3465_s23, %s3465_s23 }
  0x3e   : > { %p3468_p7 = pnand %p3466_p5, %p3794_p13  ;;  %p3475_p1 = por %p3474_p0, %p3473_p12 }
  0x40   : > { %p3469_p9 = pneg %p3468_p7 }
  0x42   : > { %p3476_p2 = pnand %p3475_p1, %p3469_p9 }
  0x44   : > { %3479 = shalt.err (!%p3476_p2)
}
  0x45   : > { %3141 = dma.hbm_to_vmem [thread:$0]  (!%p3778_p11), %s4515_s10, 1024, %s3782_s26, [#allocation9], %s3645_s29, %s3645_s29, %s3646_s20  }
  0x46   : > { %s3480_s18 = scalar_lea.hbm %s4513_s8, 1024 }
  0x47   : > { %p3481_p6 = scmp.ne.s32.totalorder %s4513_s8, %s3480_s18  ;;  %p3487_p5 = scmp.lt.u32.totalorder %s3480_s18, %s4513_s8 }
  0x49   : > { %p3483_p10 = pnand %p3481_p6, %p3794_p13 }
  0x4b   : > { %p3484_p3 = pneg %p3483_p10 }
  0x4d   : > { %p3489_p7 = pnand %p3487_p5, %p3484_p3 }
  0x4f   : > { %3492 = shalt.err (!%p3489_p7)
}
  0x50   : > { %s3493_s23 = scalar_lea.vmem %s412_s28, 1024  ;;  %p3501_p1 = scmp.lt.s32.totalorder %s412_s28, %s412_s28 }
  0x51   : > { %p3494_p9 = scmp.ne.s32.totalorder %s412_s28, %s3493_s23  ;;  %p3502_p2 = scmp.lt.s32.totalorder %s3493_s23, %s3493_s23 }
  0x53   : > { %p3496_p12 = pnand %p3494_p9, %p3794_p13  ;;  %p3503_p4 = por %p3502_p2, %p3501_p1 }
  0x55   : > { %p3497_p0 = pneg %p3496_p12 }
  0x57   : > { %p3504_p8 = pnand %p3503_p4, %p3497_p0 }
  0x59   : > { %3507 = shalt.err (!%p3504_p8)
}
  0x5a   : > { %3138 = dma.hbm_to_vmem [thread:$0]  (!%p3778_p11), %s4513_s8, 1024, %s412_s28, [#allocation6], %s3645_s29, %s3645_s29, %s3646_s20  }
  0x5b   : > { %s3647_s7 = smov [#allocation10]   ;;  %s3508_s22 = scalar_lea.hbm %s4517_s12, 1024 }
  0x5c   : > { %s443_s9 = sshll.u32 %s3647_s7, 4  ;;  %p3509_p4 = scmp.ne.s32.totalorder %s4517_s12, %s3508_s22  ;;  %s444_s9 = int_to_ptr.vmem [resolvable:$true] %s443_s9 }
  0x5d   : > { %p3515_p10 = scmp.lt.u32.totalorder %s3508_s22, %s4517_s12 }
  0x5e   : > { %p3511_p8 = pnand %p3509_p4, %p3794_p13 }
  0x60   : > { %p3512_p6 = pneg %p3511_p8 }
  0x62   : > { %p3517_p3 = pnand %p3515_p10, %p3512_p6 }
  0x64   : > { %3520 = shalt.err (!%p3517_p3)
}
  0x65   : > { %s3521_s28 = scalar_lea.vmem %s444_s9, 1024  ;;  %p3529_p12 = scmp.lt.s32.totalorder %s444_s9, %s444_s9 }
  0x66   : > { %p3522_p5 = scmp.ne.s32.totalorder %s444_s9, %s3521_s28  ;;  %p3530_p0 = scmp.lt.s32.totalorder %s3521_s28, %s3521_s28 }
  0x68   : > { %p3524_p7 = pnand %p3522_p5, %p3794_p13  ;;  %p3531_p1 = por %p3530_p0, %p3529_p12 }
  0x6a   : > { %p3525_p9 = pneg %p3524_p7 }
  0x6c   : > { %p3532_p2 = pnand %p3531_p1, %p3525_p9 }
  0x6e   : > { %3535 = shalt.err (!%p3532_p2)
}
  0x6f   : > { %3144 = dma.hbm_to_vmem [thread:$0]  (!%p3778_p11), %s4517_s12, 1024, %s444_s9, [#allocation9], %s3645_s29, %s3645_s29, %s3646_s20  }
  0x70   : > { %s3888_s13 = sadd.s32 1, %s3640_s16   ;;  %s91_s24 = sadd.s32 1, %s3636_s15 }
  0x71   : > { %s88_s7 = ssub.s32 %s3640_s16, %s3888_s13  ;;  %p98_p13 = scmp.ne.s32.totalorder %s3636_s15, %s3632_s30 }
  0x72   : > { %p89_p4 = scmp.eq.s32.totalorder %s88_s7, 0  ;;  %p99_p8 = scmp.eq.s32.totalorder %s3640_s16, 0 }
  0x73   : > { %p4539_p6 = scmp.eq.s32.totalorder %s3748_s17, 1  ;;  %p3157_p3 = scmp.lt.s32.totalorder %s3640_s16, 2 }
  0x74   : > { %s3904_s18 = scalar_select %p89_p4, %s3636_s15, %s91_s24  }
  0x75   : > { %p3898_p10 = por %p4539_p6, %p98_p13  ;;  %p100_p5 = por %p99_p8, %p98_p13 }
  0x76   : > { %s476_s22 = sand.u32 1, %s3636_s15   ;;  %s2654_s9 = sshll.u32 %s3640_s16, 9 }
  0x77   : > { %s2526_s25 = sshll.u32 %s476_s22, 5  ;;  %s3911_s23 = scalar_lea.hbm %s4507_s2, %s2654_s9 }
  0x78   : > { %s480_s28 = scalar_lea.vmem [#allocation2], %s2526_s25  ;;  %p3915_p11 = pnand %p3157_p3, %p100_p5 }
  0x79   : > { %s487_s26 = sshll.u32 %s480_s28, 4  ;;  %s3919_s24 = scalar_lea.sflag [#allocation3], %s476_s22  ;;  %s3913_s26 = int_to_ptr.vmem [resolvable:$true] %s487_s26 }
  0x7a   : > { %s3536_s7 = scalar_lea.hbm %s3911_s23, 512  ;;  %p3538_p9 = pneg %p3915_p11 }
  0x7b   : > { %p3537_p7 = scmp.ne.s32.totalorder %s3911_s23, %s3536_s7  ;;  %s3541_s27 = scalar_lea.hbm %s4507_s2, 1024 }
  0x7c   : > { %p3542_p1 = scmp.lt.u32.totalorder %s3911_s23, %s4507_s2  ;;  %p3543_p2 = scmp.lt.u32.totalorder %s3541_s27, %s3536_s7 }
  0x7d   : > { %p3539_p12 = pnand %p3538_p9, %p3537_p7  ;;  %p3545_p4 = scmp.lt.u32.totalorder %s3536_s7, %s3911_s23 }
  0x7e   : > { %p3544_p13 = por %p3543_p2, %p3542_p1 }
  0x7f   : > { %p3540_p0 = pneg %p3539_p12 }
  0x80   : > { %p3546_p8 = por %p3545_p4, %p3544_p13 }
  0x82   : > { %p3547_p6 = pnand %p3546_p8, %p3540_p0 }
  0x84   : > { %3550 = shalt.err (!%p3547_p6)
}
  0x85   : > { %s3551_s22 = scalar_lea.vmem %s3913_s26, 512  ;;  %s3648_s25 = smov [#allocation2]  }
  0x86   : > { %p3552_p3 = scmp.ne.s32.totalorder %s3913_s26, %s3551_s22  ;;  %s3556_s9 = sshll.u32 %s3648_s25, 4  ;;  %s3557_s9 = int_to_ptr.vmem [resolvable:$false] %s3556_s9 }
  0x87   : > { %s3558_s14 = scalar_lea.vmem %s3557_s9, 1024  ;;  %p3559_p12 = scmp.lt.s32.totalorder %s3913_s26, %s3557_s9 }
  0x88   : > { %p3554_p5 = pnand %p3552_p3, %p3538_p9  ;;  %p3560_p1 = scmp.lt.s32.totalorder %s3558_s14, %s3551_s22 }
  0x8a   : > { %p3555_p7 = pneg %p3554_p5  ;;  %p3561_p2 = por %p3560_p1, %p3559_p12 }
  0x8c   : > { %p3562_p13 = pnand %p3561_p2, %p3555_p7 }
  0x8e   : > { %3565 = shalt.err (!%p3562_p13)
}
  0x8f   : > { %3148 = dma.hbm_to_vmem [thread:$0]  (!%p3915_p11), %s3911_s23, 512, %s3913_s26, %s3919_s24, %s3645_s29, %s3645_s29, %s3646_s20  }
  0x90   : > { %p4542_p9 = scmp.ne.s32.totalorder %s4536_s21, 0 }
  0x91   : > { %s3953_s7 = sand.u32 (!%p4542_p9), 1, %s3632_s30   ;;  %p4543_p0 = scmp.ne.s32.totalorder (!%p4542_p9), %s4533_s19, 0 }
  0x92   : > { %506 = sbr.rel (%p4542_p9) target bundleno = 3075 (0xc03), region = 76  ;;  %s2530_s27 = sshll.u32 (!%p4542_p9), %s3953_s7, 5 }
  0x93   : > { %s509_s28 = scalar_lea.sflag (!%p4542_p9), [#allocation3], %s3953_s7  ;;  %s3957_s22 = scalar_lea.vmem (!%p4542_p9), [#allocation2], %s2530_s27 }
  0x99   : > { %3611 = dma.done.wait (%p4543_p0), %s509_s28, 512  }
  0x9a   : > { %3613 = vsyncadd (%p4543_p0), %s509_s28, 4294966784  ;;  %p4544_p11 = scmp.eq.s32.totalorder %s3748_s17, 0 }
  0x9c   : > { %3615 = dma.done.wait (%p4544_p11), [#allocation6], 2048   ;;  %p4545_p4 = pmov %p4544_p11 }
  0x9e   : > { %3617 = vsyncadd (%p4545_p4), [#allocation6], 4294965248  ;;  %p4546_p8 = pmov %p4545_p4 }
  0x9f   : > { %p4547_p6 = pmov %p4545_p4 }
  0xa0   : > { %3619 = dma.done.wait (%p4546_p8), [#allocation9], 2048  }
  0xa1   : > { %3621 = vsyncadd (%p4547_p6), [#allocation9], 4294965248  ;;  %p587_p3 = scmp.lt.s32.totalorder %s3748_s17, 1  ;;  %v3203_v0 = vld [vmem:[%s4509_s4] sm:$0xff]   ;;  %vm705_vm0 = vcmask 130048   ;;  %v4001_v11 = vld [vmem:[#allocation5 + $0x8] sm:$0xff]  }
  0xa2   : > { %2806 = vmatprep.subr.bf16.mxu1 %v3203_v0  ;;  %v3999_v10 = vld [vmem:[#allocation5] sm:$0xff]   ;;  %v4006_v12 = vld [vmem:[#allocation5 + $0x10] sm:$0xff]   ;;  %v4010_v13 = vld [vmem:[#allocation5 + $0x18] sm:$0xff]   ;;  %s4548_s29 = sld [smem:[#allocation19_spill]]  ;;  %vm3650_vm1 = vmmov 0   ;;  %s4549_s26 = sld [smem:[#allocation18_spill]] }
  0xa3   : > { %s3973_s21 = scalar_select %p587_p3, %s3748_s17, 1  ;;  %2807 = vmatpush3.bf16.msra.mxu1 %v3203_v0  ;;  %2856 = vmatprep.subr.bf16.mxu0 %v3999_v10  ;;  %v4014_v14 = vld [vmem:[#allocation5 + $0x20] sm:$0xff]   ;;  %v4018_v15 = vld [vmem:[#allocation5 + $0x28] sm:$0xff]   ;;  %v4022_v16 = vld [vmem:[#allocation5 + $0x30] sm:$0xff]   ;;  %vm1966_vm2 = vcmask 523264  }
  0xa4   : > { %2857 = vmatpush3.bf16.msra.mxu0 %v3999_v10  ;;  %v4030_v17 = vld [vmem:[%s4510_s5] ss:$0 sm:$0xff]  ;;  %s4550_s25 = sld [smem:[#allocation20_spill]]  ;;  %s4551_s27 = sld [smem:[#allocation21_spill]] }
  0xa5   : > { %s2655_s19 = sshll.u32 %s3973_s21, 6  ;;  %2858 = vmatprep.subr.bf16.mxu0 %v4001_v11  ;;  %s2535_s28 = sshll.u32 %s3953_s7, 3 }
  0xa6   : > { %s591_s23 = scalar_lea.vmem %s4505_s0, %s2655_s19  ;;  %s3988_s9 = scalar_lea.vmem %s4506_s1, %s2655_s19 }
  0xa7   : > { %v3204_v1 = vld [vmem:[%s591_s23] sm:$0xff]   ;;  %v3205_v2 = vld [vmem:[%s591_s23 + $0x8] sm:$0xff]   ;;  %v3206_v3 = vld [vmem:[%s591_s23 + $0x10] sm:$0xff]   ;;  %s2651_s20 = sshll.u32 %s3748_s17, 7  ;;  %s4553_s24 = sld [smem:[#allocation23_spill]] }
  0xa8   : > { %2808 = vmatprep.mubr.msk.bf16.mxu1 %vm705_vm0, %v3204_v1  ;;  %v3207_v4 = vld [vmem:[%s591_s23 + $0x18] sm:$0xff]   ;;  %v3208_v5 = vld [vmem:[%s591_s23 + $0x20] sm:$0xff]   ;;  %v3209_v6 = vld [vmem:[%s591_s23 + $0x28] sm:$0xff]   ;;  %2859 = vmatpush3.bf16.msra.mxu0 %v4001_v11  ;;  %s3651_s14 = smov [#allocation11]  }
  0xa9   : > { %2809 = vmatmul.mubr.msk.bf16.vlgmr.msra.gmra.mrb[0].mxu1 %vm705_vm0, %v3205_v2  ;;  %v3210_v7 = vld [vmem:[%s591_s23 + $0x30] sm:$0xff]   ;;  %v3211_v8 = vld [vmem:[%s591_s23 + $0x38] sm:$0xff]   ;;  %v3996_v9 = vld [vmem:[%s3988_s9] sm:$0xff]   ;;  %2860 = vmatprep.subr.bf16.mxu0 %v4006_v12  ;;  %s586_s23 = scalar_lea.vmem [#allocation11], %s2535_s28 }
  0xaa   : > { %2812 = vmatprep.mubr.msk.bf16.mxu1 %vm705_vm0, %v3206_v3 }
  0xac   : > { %2861 = vmatpush3.bf16.msra.mxu0 %v4006_v12 }
  0xad   : > { %2862 = vmatprep.subr.bf16.mxu0 %v4010_v13 }
  0xb0   : > { %2863 = vmatpush3.bf16.msra.mxu0 %v4010_v13 }
  0xb1   : > { %2813 = vmatmul.mubr.msk.bf16.gmra.mrb[4].mxu1 %vm705_vm0, %v3207_v4  ;;  %2864 = vmatprep.subr.bf16.mxu0 %v4014_v14 }
  0xb2   : > { %2816 = vmatprep.mubr.msk.bf16.mxu1 %vm705_vm0, %v3208_v5 }
  0xb4   : > { %2865 = vmatpush3.bf16.msra.mxu0 %v4014_v14 }
  0xb5   : > { %2866 = vmatprep.subr.bf16.mxu0 %v4018_v15 }
  0xb8   : > { %2867 = vmatpush3.bf16.msra.mxu0 %v4018_v15 }
  0xb9   : > { %2817 = vmatmul.mubr.msk.bf16.gmra.mrb[8].mxu1 %vm705_vm0, %v3209_v6  ;;  %2868 = vmatprep.subr.bf16.mxu0 %v4022_v16 }
  0xba   : > { %2820 = vmatprep.mubr.msk.bf16.mxu1 %vm705_vm0, %v3210_v7 }
  0xbc   : > { %2869 = vmatpush3.bf16.msra.mxu0 %v4022_v16 }
  0xc1   : > { %2821 = vmatmul.mubr.msk.bf16.gmra.mrb[12].mxu1 %vm705_vm0, %v3211_v8 }
  0xc2   : > { %2840 = vmatprep.mubr.bf16.mxu1 %v3996_v9 }
 0x17c   : > { %v2810_v18 = vpop.f32.mrb[0].mxu1 }
 0x17d   : > { %v4033_v19 = vadd.f32 %v2810_v18, %v4030_v17  ;;  %v764_v20 = vpop.f32.mrb[1].mxu1 }
 0x17e   : > { %v4036_v21 = vadd.f32 %v4030_v17, %v764_v20  ;;  %v2811_v22 = vpop.f32.mrb[2].mxu1 }
 0x17f   : > { %v2561_v23 = vmul.f32 -1.442695, %v4033_v19  ;;  %v4040_v24 = vadd.f32 %v2811_v22, %v4030_v17  ;;  %v767_v25 = vpop.f32.mrb[3].mxu1 }
 0x180   : > { %v2559_v26 = vmul.f32 -1.442695, %v4036_v21  ;;  %v4044_v27 = vadd.f32 %v4030_v17, %v767_v25 }
 0x181   : > { %3256 = vpow2.f32 %v2561_v23  ;;  %v2562_v28 = vmul.f32 -1.442695, %v4040_v24 }
 0x182   : > { %3258 = vpow2.f32 %v2559_v26  ;;  %v2560_v29 = vmul.f32 -1.442695, %v4044_v27 }
 0x183   : > { %3260 = vpow2.f32 %v2562_v28 }
 0x184   : > { %3262 = vpow2.f32 %v2560_v29  ;;  %v2814_v30 = vpop.f32.mrb[4].mxu1 }
 0x185   : > { %v4049_v31 = vadd.f32 %v2814_v30, %v4030_v17  ;;  %v780_v32 = vpop.f32.mrb[5].mxu1 }
 0x186   : > { %v4052_v33 = vadd.f32 %v4030_v17, %v780_v32  ;;  %v2815_v34 = vpop.f32.mrb[6].mxu1 }
 0x187   : > { %v2565_v35 = vmul.f32 -1.442695, %v4049_v31  ;;  %v4056_v36 = vadd.f32 %v2815_v34, %v4030_v17  ;;  %v783_v37 = vpop.f32.mrb[7].mxu1 }
 0x188   : > { %v2563_v38 = vmul.f32 -1.442695, %v4052_v33  ;;  %v4060_v39 = vadd.f32 %v4030_v17, %v783_v37 }
 0x189   : > { %3264 = vpow2.f32 %v2565_v35  ;;  %v2566_v40 = vmul.f32 -1.442695, %v4056_v36 }
 0x18a   : > { %3266 = vpow2.f32 %v2563_v38  ;;  %v2564_v41 = vmul.f32 -1.442695, %v4060_v39 }
 0x18b   : > { %v3257_v42 = vpop.eup %3256  ;;  %3268 = vpow2.f32 %v2566_v40 }
 0x18c   : > { %v3259_v43 = vpop.eup %3258  ;;  %v877_v44 = vadd.f32 1.0, %v3257_v42  ;;  %3270 = vpow2.f32 %v2564_v41  ;;  %v2818_v45 = vpop.f32.mrb[8].mxu1 }
 0x18d   : > { %v3261_v46 = vpop.eup %3260  ;;  %v875_v47 = vadd.f32 1.0, %v3259_v43  ;;  %v4065_v48 = vadd.f32 %v2818_v45, %v4030_v17  ;;  %v796_v49 = vpop.f32.mrb[9].mxu1 }
 0x18e   : > { %v3263_v50 = vpop.eup %3262  ;;  %3272 = vrcp.f32 %v877_v44  ;;  %v878_v51 = vadd.f32 1.0, %v3261_v46  ;;  %v4068_v52 = vadd.f32 %v4030_v17, %v796_v49  ;;  %v2819_v53 = vpop.f32.mrb[10].mxu1 }
 0x18f   : > { %3274 = vrcp.f32 %v875_v47  ;;  %v876_v54 = vadd.f32 1.0, %v3263_v50  ;;  %v2569_v55 = vmul.f32 -1.442695, %v4065_v48  ;;  %v4072_v56 = vadd.f32 %v2819_v53, %v4030_v17  ;;  %v799_v57 = vpop.f32.mrb[11].mxu1 }
 0x190   : > { %3276 = vrcp.f32 %v878_v51  ;;  %v2567_v58 = vmul.f32 -1.442695, %v4068_v52  ;;  %v4076_v59 = vadd.f32 %v4030_v17, %v799_v57 }
 0x191   : > { %3278 = vrcp.f32 %v876_v54  ;;  %v2570_v60 = vmul.f32 -1.442695, %v4072_v56 }
 0x192   : > { %3280 = vpow2.f32 %v2569_v55  ;;  %v2568_v61 = vmul.f32 -1.442695, %v4076_v59 }
 0x193   : > { %v3265_v62 = vpop.eup %3264  ;;  %3282 = vpow2.f32 %v2567_v58 }
 0x194   : > { %v3267_v63 = vpop.eup %3266  ;;  %v881_v0 = vadd.f32 1.0, %v3265_v62  ;;  %3284 = vpow2.f32 %v2570_v60  ;;  %v2822_v1 = vpop.f32.mrb[12].mxu1 }
 0x195   : > { %v3269_v2 = vpop.eup %3268  ;;  %v879_v3 = vadd.f32 1.0, %v3267_v63  ;;  %3286 = vpow2.f32 %v2568_v61  ;;  %v4081_v4 = vadd.f32 %v2822_v1, %v4030_v17  ;;  %v812_v5 = vpop.f32.mrb[13].mxu1 }
 0x196   : > { %v3271_v6 = vpop.eup %3270  ;;  %3288 = vrcp.f32 %v881_v0  ;;  %v882_v7 = vadd.f32 1.0, %v3269_v2  ;;  %v4084_v8 = vadd.f32 %v4030_v17, %v812_v5  ;;  %v2823_v18 = vpop.f32.mrb[14].mxu1 }
 0x197   : > { %3290 = vrcp.f32 %v879_v3  ;;  %v880_v20 = vadd.f32 1.0, %v3271_v6  ;;  %v2573_v22 = vmul.f32 -1.442695, %v4081_v4  ;;  %v4088_v23 = vadd.f32 %v2823_v18, %v4030_v17  ;;  %v815_v25 = vpop.f32.mrb[15].mxu1 }
 0x198   : > { %v3273_v26 = vpop.eup %3272  ;;  %3292 = vrcp.f32 %v882_v7  ;;  %v2571_v28 = vmul.f32 -1.442695, %v4084_v8  ;;  %v4092_v29 = vadd.f32 %v4030_v17, %v815_v25 }
 0x199   : > { %v3275_v30 = vpop.eup %3274  ;;  %3294 = vrcp.f32 %v880_v20  ;;  %v2574_v32 = vmul.f32 -1.442695, %v4088_v23  ;;  %v4097_v38 = vmul.f32 %v3273_v26, %v4033_v19 }
 0x19a   : > { %v3277_v34 = vpop.eup %3276  ;;  %3296 = vpow2.f32 %v2573_v22  ;;  %v2572_v35 = vmul.f32 -1.442695, %v4092_v29  ;;  %v4103_v17 = vmul.f32 %v3275_v30, %v4036_v21 }
 0x19b   : > { %v3279_v37 = vpop.eup %3278  ;;  %v4100_v40 = vmul.f32 %v3277_v34, %v4040_v24  ;;  %3298 = vpow2.f32 %v2571_v28 }
 0x19c   : > { %v3281_v41 = vpop.eup %3280  ;;  %v4106_v42 = vmul.f32 %v3279_v37, %v4044_v27  ;;  %3300 = vpow2.f32 %v2574_v32  ;;  %v4172_v37 = vld [vmem:[%s3988_s9 + $0x20] sm:$0xff]  }
 0x19d   : > { %v3283_v43 = vpop.eup %3282  ;;  %v885_v44 = vadd.f32 1.0, %v3281_v41  ;;  %3302 = vpow2.f32 %v2572_v35  ;;  %v963_v45 = vpack.c.bf16 %v4100_v40, %v4097_v38  ;;  %v4177_v41 = vld [vmem:[%s3988_s9 + $0x28] sm:$0xff]  }
 0x19e   : > { %v3285_v19 = vpop.eup %3284  ;;  %v883_v46 = vadd.f32 1.0, %v3283_v43  ;;  %v962_v24 = vpack.c.bf16 %v4106_v42, %v4103_v17  ;;  %v4180_v43 = vld [vmem:[%s3988_s9 + $0x30] sm:$0xff]  }
 0x19f   : > { %v3287_v47 = vpop.eup %3286  ;;  %3304 = vrcp.f32 %v885_v44  ;;  %v886_v49 = vadd.f32 1.0, %v3285_v19  ;;  %v4185_v44 = vld [vmem:[%s3988_s9 + $0x38] sm:$0xff]  }
 0x1a0   : > { %v3289_v21 = vpop.eup %3288  ;;  %3306 = vrcp.f32 %v883_v46  ;;  %v884_v50 = vadd.f32 1.0, %v3287_v47  ;;  %2824 = vmatprep.subr.bf16.mxu1 %v962_v24 }
 0x1a1   : > { %v3291_v27 = vpop.eup %3290  ;;  %3308 = vrcp.f32 %v886_v49  ;;  %2825 = vmatpush3.bf16.msra.mxu1 %v962_v24  ;;  %v4113_v54 = vmul.f32 %v3289_v21, %v4049_v31 }
 0x1a2   : > { %v3293_v51 = vpop.eup %3292  ;;  %3310 = vrcp.f32 %v884_v50  ;;  %2826 = vmatprep.subr.bf16.mxu1 %v963_v45  ;;  %v4119_v58 = vmul.f32 %v3291_v27, %v4052_v33 }
 0x1a3   : > { %v3295_v53 = vpop.eup %3294  ;;  %v4116_v55 = vmul.f32 %v3293_v51, %v4056_v36 }
 0x1a4   : > { %v3297_v57 = vpop.eup %3296  ;;  %v4122_v60 = vmul.f32 %v3295_v53, %v4060_v39 }
 0x1a5   : > { %v3299_v61 = vpop.eup %3298  ;;  %v889_v62 = vadd.f32 1.0, %v3297_v57  ;;  %2827 = vmatpush3.bf16.msra.mxu1 %v963_v45  ;;  %v965_v63 = vpack.c.bf16 %v4116_v55, %v4113_v54  ;;  %v4189_v45 = vld [vmem:[#allocation5 + $0x38] sm:$0xff]  }
 0x1a6   : > { %v3301_v0 = vpop.eup %3300  ;;  %v887_v1 = vadd.f32 1.0, %v3299_v61  ;;  %v964_v31 = vpack.c.bf16 %v4122_v60, %v4119_v58  ;;  %2870 = vmatprep.subr.bf16.mxu0 %v4189_v45 }
 0x1a7   : > { %v3303_v36 = vpop.eup %3302  ;;  %3312 = vrcp.f32 %v889_v62  ;;  %v890_v2 = vadd.f32 1.0, %v3301_v0  ;;  %2871 = vmatpush3.bf16.msra.mxu0 %v4189_v45 }
 0x1a8   : > { %3314 = vrcp.f32 %v887_v1  ;;  %v888_v33 = vadd.f32 1.0, %v3303_v36  ;;  %2828 = vmatprep.subr.bf16.mxu1 %v964_v31  ;;  %2920 = vmatprep.subr.bf16.mxu0 %v3999_v10 }
 0x1a9   : > { %v3305_v3 = vpop.eup %3304  ;;  %3316 = vrcp.f32 %v890_v2  ;;  %2829 = vmatpush3.bf16.msra.mxu1 %v964_v31 }
 0x1aa   : > { %v3307_v39 = vpop.eup %3306  ;;  %3318 = vrcp.f32 %v888_v33  ;;  %2830 = vmatprep.subr.bf16.mxu1 %v965_v63  ;;  %v4129_v7 = vmul.f32 %v3305_v3, %v4065_v48 }
 0x1ab   : > { %v3309_v5 = vpop.eup %3308  ;;  %v4135_v20 = vmul.f32 %v3307_v39, %v4068_v52 }
 0x1ac   : > { %v3311_v6 = vpop.eup %3310  ;;  %v4132_v18 = vmul.f32 %v3309_v5, %v4072_v56 }
 0x1ad   : > { %v4138_v22 = vmul.f32 %v3311_v6, %v4076_v59  ;;  %2831 = vmatpush3.bf16.msra.mxu1 %v965_v63 }
 0x1ae   : > { %v967_v25 = vpack.c.bf16 %v4132_v18, %v4129_v7 }
 0x1af   : > { %v966_v26 = vpack.c.bf16 %v4138_v22, %v4135_v20 }
 0x1b1   : > { %v3313_v28 = vpop.eup %3312  ;;  %2832 = vmatprep.subr.bf16.mxu1 %v966_v26 }
 0x1b2   : > { %v3315_v48 = vpop.eup %3314  ;;  %2833 = vmatpush3.bf16.msra.mxu1 %v966_v26  ;;  %v4145_v59 = vmul.f32 %v3313_v28, %v4081_v4 }
 0x1b3   : > { %v3317_v56 = vpop.eup %3316  ;;  %2834 = vmatprep.subr.bf16.mxu1 %v967_v25  ;;  %v4151_v32 = vmul.f32 %v3315_v48, %v4084_v8  ;;  %v4164_v8 = vld [vmem:[%s3988_s9 + $0x10] sm:$0xff]  }
 0x1b4   : > { %v3319_v52 = vpop.eup %3318  ;;  %v4148_v30 = vmul.f32 %v3317_v56, %v4088_v23  ;;  %v4161_v23 = vld [vmem:[%s3988_s9 + $0x8] sm:$0xff]  }
 0x1b5   : > { %v4154_v34 = vmul.f32 %v3319_v52, %v4092_v29  ;;  %v4169_v29 = vld [vmem:[%s3988_s9 + $0x18] sm:$0xff]   ;;  %s2362_s9 = scalar_lea.sflag [#allocation4], %s3953_s7 }
 0x1b6   : > { %2835 = vmatpush3.bf16.msra.mxu1 %v967_v25  ;;  %v969_v35 = vpack.c.bf16 %v4148_v30, %v4145_v59  ;;  %v2575_v25 = vld [vmem:[%s4548_s29] ss:$0 sm:$0xff] }
 0x1b7   : > { %v968_v4 = vpack.c.bf16 %v4154_v34, %v4151_v32  ;;  %v4214_v28 = vadd.f32 %v2575_v25, %v4097_v38  ;;  %v4217_v48 = vadd.f32 %v2575_v25, %v4100_v40  ;;  %v4220_v52 = vadd.f32 %v2575_v25, %v4103_v17 }
 0x1b8   : > { %v4230_v17 = vadd.f32 %v2575_v25, %v4113_v54 }
 0x1b9   : > { %2836 = vmatprep.subr.bf16.mxu1 %v968_v4 }
 0x1ba   : > { %2837 = vmatpush3.bf16.msra.mxu1 %v968_v4 }
 0x1bb   : > { %2838 = vmatprep.subr.bf16.mxu1 %v969_v35 }
 0x1be   : > { %2839 = vmatpush3.bf16.msra.mxu1 %v969_v35  ;;  %v4223_v35 = vadd.f32 %v2575_v25, %v4106_v42  ;;  %v4233_v42 = vadd.f32 %v2575_v25, %v4116_v55 }
 0x1c1   : > { %2841 = vmatmul.mubr.bf16.vlgmr.msra.gmra.mrb[16].mxu1 %v4161_v23 }
 0x1c2   : > { %2844 = vmatprep.mubr.bf16.mxu1 %v4164_v8 }
 0x1c9   : > { %2845 = vmatmul.mubr.bf16.gmra.mrb[20].mxu1 %v4169_v29 }
 0x1ca   : > { %2848 = vmatprep.mubr.bf16.mxu1 %v4172_v37 }
 0x1d1   : > { %2849 = vmatmul.mubr.bf16.gmra.mrb[24].mxu1 %v4177_v41 }
 0x1d2   : > { %2852 = vmatprep.mubr.bf16.mxu1 %v4180_v43 }
 0x1d9   : > { %2853 = vmatmul.mubr.bf16.gmra.mrb[28].mxu1 %v4185_v44 }
 0x1da   : > { %2904 = vmatprep.mubr.bf16.mxu1 %v3996_v9 }
 0x294   : > { %v2842_v19 = vpop.f32.mrb[16].mxu1 }
 0x295   : > { %v1052_v46 = vpop.f32.mrb[17].mxu1 }
 0x296   : > { %v2843_v24 = vpop.f32.mrb[18].mxu1 }
 0x297   : > { %v1116_v47 = vpack.c.bf16 %v2843_v24, %v2842_v19  ;;  %v1055_v49 = vpop.f32.mrb[19].mxu1 }
 0x298   : > { %v1115_v21 = vpack.c.bf16 %v1055_v49, %v1052_v46 }
 0x29a   : > { %2872 = vmatprep.mubr.bf16.mxu0 %v1115_v21 }
 0x29b   : > { %2873 = vmatmul.mubr.bf16.vlgmr.msra.gmra.mrb[0].mxu0 %v1116_v47 }
 0x29c   : > { %v2846_v50 = vpop.f32.mrb[20].mxu1  ;;  %2921 = vmatpush3.bf16.msra.mxu0 %v3999_v10 }
 0x29d   : > { %v1068_v27 = vpop.f32.mrb[21].mxu1  ;;  %2922 = vmatprep.subr.bf16.mxu0 %v4001_v11 }
 0x29e   : > { %v2847_v51 = vpop.f32.mrb[22].mxu1 }
 0x29f   : > { %v1118_v53 = vpack.c.bf16 %v2847_v51, %v2846_v50  ;;  %v1071_v57 = vpop.f32.mrb[23].mxu1  ;;  %v4239_v51 = vadd.f32 %v2575_v25, %v4122_v60  ;;  %v4249_v60 = vadd.f32 %v2575_v25, %v4132_v18 }
 0x2a0   : > { %v1117_v61 = vpack.c.bf16 %v1071_v57, %v1068_v27  ;;  %2923 = vmatpush3.bf16.msra.mxu0 %v4001_v11  ;;  %v4236_v27 = vadd.f32 %v2575_v25, %v4119_v58  ;;  %v4246_v58 = vadd.f32 %v2575_v25, %v4129_v7 }
 0x2a1   : > { %2924 = vmatprep.subr.bf16.mxu0 %v4006_v12 }
 0x2a2   : > { %2876 = vmatprep.mubr.bf16.mxu0 %v1117_v61 }
 0x2a3   : > { %2877 = vmatmul.mubr.bf16.gmra.mrb[4].mxu0 %v1118_v53 }
 0x2a4   : > { %v2850_v62 = vpop.f32.mrb[24].mxu1  ;;  %2925 = vmatpush3.bf16.msra.mxu0 %v4006_v12 }
 0x2a5   : > { %v1084_v63 = vpop.f32.mrb[25].mxu1  ;;  %2926 = vmatprep.subr.bf16.mxu0 %v4010_v13 }
 0x2a6   : > { %v2851_v0 = vpop.f32.mrb[26].mxu1 }
 0x2a7   : > { %v1120_v1 = vpack.c.bf16 %v2851_v0, %v2850_v62  ;;  %v1087_v31 = vpop.f32.mrb[27].mxu1 }
 0x2a8   : > { %v1119_v36 = vpack.c.bf16 %v1087_v31, %v1084_v63  ;;  %2927 = vmatpush3.bf16.msra.mxu0 %v4010_v13 }
 0x2a9   : > { %2928 = vmatprep.subr.bf16.mxu0 %v4014_v14 }
 0x2aa   : > { %2880 = vmatprep.mubr.bf16.mxu0 %v1119_v36  ;;  %v4252_v36 = vadd.f32 %v2575_v25, %v4135_v20  ;;  %v4262_v20 = vadd.f32 %v2575_v25, %v4145_v59 }
 0x2ab   : > { %2881 = vmatmul.mubr.bf16.gmra.mrb[8].mxu0 %v1120_v1 }
 0x2ac   : > { %v2854_v2 = vpop.f32.mrb[28].mxu1  ;;  %2929 = vmatpush3.bf16.msra.mxu0 %v4014_v14 }
 0x2ad   : > { %v1100_v33 = vpop.f32.mrb[29].mxu1  ;;  %2930 = vmatprep.subr.bf16.mxu0 %v4018_v15 }
 0x2ae   : > { %v2855_v3 = vpop.f32.mrb[30].mxu1 }
 0x2af   : > { %v1122_v39 = vpack.c.bf16 %v2855_v3, %v2854_v2  ;;  %v1103_v5 = vpop.f32.mrb[31].mxu1  ;;  %v4255_v2 = vadd.f32 %v2575_v25, %v4138_v22  ;;  %v4265_v22 = vadd.f32 %v2575_v25, %v4148_v30 }
 0x2b0   : > { %v1121_v6 = vpack.c.bf16 %v1103_v5, %v1100_v33  ;;  %2931 = vmatpush3.bf16.msra.mxu0 %v4018_v15 }
 0x2b1   : > { %2932 = vmatprep.subr.bf16.mxu0 %v4022_v16 }
 0x2b2   : > { %2884 = vmatprep.mubr.bf16.mxu0 %v1121_v6 }
 0x2b3   : > { %2885 = vmatmul.mubr.bf16.gmra.mrb[12].mxu0 %v1122_v39 }
 0x2b4   : > { %2933 = vmatpush3.bf16.msra.mxu0 %v4022_v16 }
 0x2b5   : > { %2934 = vmatprep.subr.bf16.mxu0 %v4189_v45 }
 0x2b8   : > { %2935 = vmatpush3.bf16.msra.mxu0 %v4189_v45 }
 0x2b9   : > { %2984 = vmatprep.subr.bf16.mxu0 %v3999_v10 }
 0x36e   : > { %v2874_v26 = vpop.f32.mrb[0].mxu0 }
 0x36f   : > { %v1205_v56 = vpop.f32.mrb[1].mxu0  ;;  %v1214_v19 = vadd.f32 %v2874_v26, %v4214_v28 }
 0x370   : > { %v2875_v4 = vpop.f32.mrb[2].mxu0  ;;  %v1206_v47 = vadd.f32 %v1205_v56, %v4220_v52 }
 0x371   : > { %v1217_v46 = vadd.f32 %v2875_v4, %v4217_v48  ;;  %v1208_v24 = vpop.f32.mrb[3].mxu0 }
 0x372   : > { %v1209_v38 = vadd.f32 %v1208_v24, %v4223_v35 }
 0x373   : > { %v1269_v49 = vpack.c.bf16 %v1217_v46, %v1214_v19  ;;  %v4268_v19 = vadd.f32 %v2575_v25, %v4151_v32  ;;  %v4271_v46 = vadd.f32 %v2575_v25, %v4154_v34 }
 0x374   : > { %v1268_v40 = vpack.c.bf16 %v1209_v38, %v1206_v47 }
 0x376   : > { %v2878_v21 = vpop.f32.mrb[4].mxu0  ;;  %2888 = vmatprep.subr.bf16.mxu1 %v1268_v40 }
 0x377   : > { %v1221_v50 = vpop.f32.mrb[5].mxu0  ;;  %2889 = vmatpush3.bf16.msra.mxu1 %v1268_v40  ;;  %v1230_v57 = vadd.f32 %v2878_v21, %v4230_v17 }
 0x378   : > { %v2879_v53 = vpop.f32.mrb[6].mxu0  ;;  %2890 = vmatprep.subr.bf16.mxu1 %v1269_v49  ;;  %v1222_v54 = vadd.f32 %v1221_v50, %v4236_v27 }
 0x379   : > { %v1233_v61 = vadd.f32 %v2879_v53, %v4233_v42  ;;  %v1224_v62 = vpop.f32.mrb[7].mxu0 }
 0x37a   : > { %v1225_v55 = vadd.f32 %v1224_v62, %v4239_v51 }
 0x37b   : > { %v1271_v63 = vpack.c.bf16 %v1233_v61, %v1230_v57  ;;  %2891 = vmatpush3.bf16.msra.mxu1 %v1269_v49 }
 0x37c   : > { %v1270_v0 = vpack.c.bf16 %v1225_v55, %v1222_v54 }
 0x37e   : > { %v2882_v1 = vpop.f32.mrb[8].mxu0  ;;  %2892 = vmatprep.subr.bf16.mxu1 %v1270_v0 }
 0x37f   : > { %v1237_v31 = vpop.f32.mrb[9].mxu0  ;;  %2893 = vmatpush3.bf16.msra.mxu1 %v1270_v0  ;;  %v1246_v3 = vadd.f32 %v2882_v1, %v4246_v58 }
 0x380   : > { %v2883_v33 = vpop.f32.mrb[10].mxu0  ;;  %2894 = vmatprep.subr.bf16.mxu1 %v1271_v63  ;;  %v1238_v7 = vadd.f32 %v1237_v31, %v4252_v36 }
 0x381   : > { %v1249_v39 = vadd.f32 %v2883_v33, %v4249_v60  ;;  %v1240_v5 = vpop.f32.mrb[11].mxu0 }
 0x382   : > { %v1241_v18 = vadd.f32 %v1240_v5, %v4255_v2 }
 0x383   : > { %v1273_v6 = vpack.c.bf16 %v1249_v39, %v1246_v3  ;;  %2895 = vmatpush3.bf16.msra.mxu1 %v1271_v63 }
 0x384   : > { %v1272_v26 = vpack.c.bf16 %v1241_v18, %v1238_v7 }
 0x386   : > { %v2886_v56 = vpop.f32.mrb[12].mxu0  ;;  %2896 = vmatprep.subr.bf16.mxu1 %v1272_v26 }
 0x387   : > { %v1253_v4 = vpop.f32.mrb[13].mxu0  ;;  %2897 = vmatpush3.bf16.msra.mxu1 %v1272_v26  ;;  %v1262_v47 = vadd.f32 %v2886_v56, %v4262_v20 }
 0x388   : > { %v2887_v24 = vpop.f32.mrb[14].mxu0  ;;  %2898 = vmatprep.subr.bf16.mxu1 %v1273_v6  ;;  %v1254_v59 = vadd.f32 %v1253_v4, %v4268_v19 }
 0x389   : > { %v1265_v38 = vadd.f32 %v2887_v24, %v4265_v22  ;;  %v1256_v49 = vpop.f32.mrb[15].mxu0 }
 0x38a   : > { %v1257_v30 = vadd.f32 %v1256_v49, %v4271_v46 }
 0x38b   : > { %v1275_v40 = vpack.c.bf16 %v1265_v38, %v1262_v47  ;;  %2899 = vmatpush3.bf16.msra.mxu1 %v1273_v6 }
 0x38c   : > { %v1274_v21 = vpack.c.bf16 %v1257_v30, %v1254_v59 }
 0x38e   : > { %2900 = vmatprep.subr.bf16.mxu1 %v1274_v21 }
 0x38f   : > { %2901 = vmatpush3.bf16.msra.mxu1 %v1274_v21 }
 0x390   : > { %2902 = vmatprep.subr.bf16.mxu1 %v1275_v40 }
 0x393   : > { %2903 = vmatpush3.bf16.msra.mxu1 %v1275_v40 }
 0x396   : > { %2905 = vmatmul.mubr.bf16.vlgmr.msra.gmra.mrb[32].mxu1 %v4161_v23 }
 0x397   : > { %2908 = vmatprep.mubr.bf16.mxu1 %v4164_v8 }
 0x39e   : > { %2909 = vmatmul.mubr.bf16.gmra.mrb[36].mxu1 %v4169_v29 }
 0x39f   : > { %2912 = vmatprep.mubr.bf16.mxu1 %v4172_v37 }
 0x3a6   : > { %2913 = vmatmul.mubr.bf16.gmra.mrb[40].mxu1 %v4177_v41 }
 0x3a7   : > { %2916 = vmatprep.mubr.bf16.mxu1 %v4180_v43 }
 0x3ae   : > { %2917 = vmatmul.mubr.bf16.gmra.mrb[44].mxu1 %v4185_v44 }
 0x3af   : > { %2968 = vmatprep.mubr.bf16.mxu1 %v3996_v9 }
 0x469   : > { %v2906_v32 = vpop.f32.mrb[32].mxu1 }
 0x46a   : > { %v1310_v34 = vpop.f32.mrb[33].mxu1 }
 0x46b   : > { %v2907_v25 = vpop.f32.mrb[34].mxu1 }
 0x46c   : > { %v1374_v50 = vpack.c.bf16 %v2907_v25, %v2906_v32  ;;  %v1313_v53 = vpop.f32.mrb[35].mxu1 }
 0x46d   : > { %v1373_v57 = vpack.c.bf16 %v1313_v53, %v1310_v34 }
 0x46f   : > { %2936 = vmatprep.mubr.bf16.mxu0 %v1373_v57 }
 0x470   : > { %2937 = vmatmul.mubr.bf16.vlgmr.msra.gmra.mrb[16].mxu0 %v1374_v50 }
 0x471   : > { %v2910_v61 = vpop.f32.mrb[36].mxu1  ;;  %2985 = vmatpush3.bf16.msra.mxu0 %v3999_v10 }
 0x472   : > { %v1326_v62 = vpop.f32.mrb[37].mxu1  ;;  %2986 = vmatprep.subr.bf16.mxu0 %v4001_v11 }
 0x473   : > { %v2911_v54 = vpop.f32.mrb[38].mxu1 }
 0x474   : > { %v1376_v55 = vpack.c.bf16 %v2911_v54, %v2910_v61  ;;  %v1329_v63 = vpop.f32.mrb[39].mxu1 }
 0x475   : > { %v1375_v0 = vpack.c.bf16 %v1329_v63, %v1326_v62  ;;  %2987 = vmatpush3.bf16.msra.mxu0 %v4001_v11 }
 0x476   : > { %2988 = vmatprep.subr.bf16.mxu0 %v4006_v12 }
 0x477   : > { %2940 = vmatprep.mubr.bf16.mxu0 %v1375_v0 }
 0x478   : > { %2941 = vmatmul.mubr.bf16.gmra.mrb[20].mxu0 %v1376_v55 }
 0x479   : > { %v2914_v9 = vpop.f32.mrb[40].mxu1  ;;  %2989 = vmatpush3.bf16.msra.mxu0 %v4006_v12 }
 0x47a   : > { %v1342_v1 = vpop.f32.mrb[41].mxu1  ;;  %2990 = vmatprep.subr.bf16.mxu0 %v4010_v13 }
 0x47b   : > { %v2915_v10 = vpop.f32.mrb[42].mxu1 }
 0x47c   : > { %v1378_v31 = vpack.c.bf16 %v2915_v10, %v2914_v9  ;;  %v1345_v33 = vpop.f32.mrb[43].mxu1 }
 0x47d   : > { %v1377_v3 = vpack.c.bf16 %v1345_v33, %v1342_v1  ;;  %2991 = vmatpush3.bf16.msra.mxu0 %v4010_v13 }
 0x47e   : > { %2992 = vmatprep.subr.bf16.mxu0 %v4014_v14 }
 0x47f   : > { %2944 = vmatprep.mubr.bf16.mxu0 %v1377_v3 }
 0x480   : > { %2945 = vmatmul.mubr.bf16.gmra.mrb[24].mxu0 %v1378_v31 }
 0x481   : > { %v2918_v11 = vpop.f32.mrb[44].mxu1  ;;  %2993 = vmatpush3.bf16.msra.mxu0 %v4014_v14 }
 0x482   : > { %v1358_v39 = vpop.f32.mrb[45].mxu1  ;;  %2994 = vmatprep.subr.bf16.mxu0 %v4018_v15 }
 0x483   : > { %v2919_v12 = vpop.f32.mrb[46].mxu1 }
 0x484   : > { %v1380_v5 = vpack.c.bf16 %v2919_v12, %v2918_v11  ;;  %v1361_v7 = vpop.f32.mrb[47].mxu1 }
 0x485   : > { %v1379_v18 = vpack.c.bf16 %v1361_v7, %v1358_v39  ;;  %2995 = vmatpush3.bf16.msra.mxu0 %v4018_v15 }
 0x486   : > { %2996 = vmatprep.subr.bf16.mxu0 %v4022_v16 }
 0x487   : > { %2948 = vmatprep.mubr.bf16.mxu0 %v1379_v18 }
 0x488   : > { %2949 = vmatmul.mubr.bf16.gmra.mrb[28].mxu0 %v1380_v5 }
 0x489   : > { %2997 = vmatpush3.bf16.msra.mxu0 %v4022_v16 }
 0x48a   : > { %2998 = vmatprep.subr.bf16.mxu0 %v4189_v45 }
 0x48d   : > { %2999 = vmatpush3.bf16.msra.mxu0 %v4189_v45 }
 0x543   : > { %v2938_v13 = vpop.f32.mrb[16].mxu0 }
 0x544   : > { %v1415_v14 = vpop.f32.mrb[17].mxu0  ;;  %v1424_v26 = vadd.f32 %v2938_v13, %v4214_v28 }
 0x545   : > { %v2939_v6 = vpop.f32.mrb[18].mxu0  ;;  %v1416_v15 = vadd.f32 %v1415_v14, %v4220_v52 }
 0x546   : > { %v1427_v56 = vadd.f32 %v2939_v6, %v4217_v48  ;;  %v1418_v4 = vpop.f32.mrb[19].mxu0 }
 0x547   : > { %v1419_v24 = vadd.f32 %v1418_v4, %v4223_v35 }
 0x548   : > { %v1479_v47 = vpack.c.bf16 %v1427_v56, %v1424_v26 }
 0x549   : > { %v1478_v38 = vpack.c.bf16 %v1419_v24, %v1416_v15 }
 0x54b   : > { %v2942_v49 = vpop.f32.mrb[20].mxu0  ;;  %2952 = vmatprep.subr.bf16.mxu1 %v1478_v38 }
 0x54c   : > { %v1431_v16 = vpop.f32.mrb[21].mxu0  ;;  %2953 = vmatpush3.bf16.msra.mxu1 %v1478_v38  ;;  %v1440_v45 = vadd.f32 %v2942_v49, %v4230_v17 }
 0x54d   : > { %v2943_v59 = vpop.f32.mrb[22].mxu0  ;;  %2954 = vmatprep.subr.bf16.mxu1 %v1479_v47  ;;  %v1432_v21 = vadd.f32 %v1431_v16, %v4236_v27 }
 0x54e   : > { %v1443_v30 = vadd.f32 %v2943_v59, %v4233_v42  ;;  %v1434_v40 = vpop.f32.mrb[23].mxu0 }
 0x54f   : > { %v1435_v32 = vadd.f32 %v1434_v40, %v4239_v51 }
 0x550   : > { %v1481_v34 = vpack.c.bf16 %v1443_v30, %v1440_v45  ;;  %2955 = vmatpush3.bf16.msra.mxu1 %v1479_v47 }
 0x551   : > { %v1480_v25 = vpack.c.bf16 %v1435_v32, %v1432_v21  ;;  %v3228_v21 = vld [vmem:[%s3957_s22] sm:$0xff]  }
 0x553   : > { %v2946_v50 = vpop.f32.mrb[24].mxu0  ;;  %2956 = vmatprep.subr.bf16.mxu1 %v1480_v25 }
 0x554   : > { %v1447_v53 = vpop.f32.mrb[25].mxu0  ;;  %2957 = vmatpush3.bf16.msra.mxu1 %v1480_v25  ;;  %v1456_v61 = vadd.f32 %v2946_v50, %v4246_v58 }
 0x555   : > { %v2947_v57 = vpop.f32.mrb[26].mxu0  ;;  %2958 = vmatprep.subr.bf16.mxu1 %v1481_v34  ;;  %v1448_v55 = vadd.f32 %v1447_v53, %v4252_v36 }
 0x556   : > { %v1459_v62 = vadd.f32 %v2947_v57, %v4249_v60  ;;  %v1450_v54 = vpop.f32.mrb[27].mxu0 }
 0x557   : > { %v1451_v63 = vadd.f32 %v1450_v54, %v4255_v2 }
 0x558   : > { %v1483_v0 = vpack.c.bf16 %v1459_v62, %v1456_v61  ;;  %2959 = vmatpush3.bf16.msra.mxu1 %v1481_v34 }
 0x559   : > { %v1482_v9 = vpack.c.bf16 %v1451_v63, %v1448_v55 }
 0x55b   : > { %v2950_v1 = vpop.f32.mrb[28].mxu0  ;;  %2960 = vmatprep.subr.bf16.mxu1 %v1482_v9 }
 0x55c   : > { %v1463_v10 = vpop.f32.mrb[29].mxu0  ;;  %2961 = vmatpush3.bf16.msra.mxu1 %v1482_v9  ;;  %v1472_v33 = vadd.f32 %v2950_v1, %v4262_v20 }
 0x55d   : > { %v2951_v31 = vpop.f32.mrb[30].mxu0  ;;  %2962 = vmatprep.subr.bf16.mxu1 %v1483_v0  ;;  %v1464_v39 = vadd.f32 %v1463_v10, %v4268_v19 }
 0x55e   : > { %v1475_v3 = vadd.f32 %v2951_v31, %v4265_v22  ;;  %v1466_v11 = vpop.f32.mrb[31].mxu0 }
 0x55f   : > { %v1467_v12 = vadd.f32 %v1466_v11, %v4271_v46 }
 0x560   : > { %v1485_v5 = vpack.c.bf16 %v1475_v3, %v1472_v33  ;;  %2963 = vmatpush3.bf16.msra.mxu1 %v1483_v0 }
 0x561   : > { %v1484_v7 = vpack.c.bf16 %v1467_v12, %v1464_v39 }
 0x563   : > { %2964 = vmatprep.subr.bf16.mxu1 %v1484_v7 }
 0x564   : > { %2965 = vmatpush3.bf16.msra.mxu1 %v1484_v7 }
 0x565   : > { %2966 = vmatprep.subr.bf16.mxu1 %v1485_v5 }
 0x568   : > { %2967 = vmatpush3.bf16.msra.mxu1 %v1485_v5 }
 0x56b   : > { %2969 = vmatmul.mubr.bf16.vlgmr.msra.gmra.mrb[48].mxu1 %v4161_v23 }
 0x56c   : > { %2972 = vmatprep.mubr.bf16.mxu1 %v4164_v8 }
 0x573   : > { %2973 = vmatmul.mubr.bf16.gmra.mrb[52].mxu1 %v4169_v29 }
 0x574   : > { %2976 = vmatprep.mubr.bf16.mxu1 %v4172_v37 }
 0x57b   : > { %2977 = vmatmul.mubr.bf16.gmra.mrb[56].mxu1 %v4177_v41 }
 0x57c   : > { %2980 = vmatprep.mubr.bf16.mxu1 %v4180_v43 }
 0x583   : > { %2981 = vmatmul.mubr.bf16.gmra.mrb[60].mxu1 %v4185_v44 }
 0x63e   : > { %v2970_v18 = vpop.f32.mrb[48].mxu1 }
 0x63f   : > { %v1520_v13 = vpop.f32.mrb[49].mxu1 }
 0x640   : > { %v2971_v14 = vpop.f32.mrb[50].mxu1 }
 0x641   : > { %v1584_v6 = vpack.c.bf16 %v2971_v14, %v2970_v18  ;;  %v1523_v26 = vpop.f32.mrb[51].mxu1 }
 0x642   : > { %v1583_v56 = vpack.c.bf16 %v1523_v26, %v1520_v13 }
 0x644   : > { %3000 = vmatprep.mubr.bf16.mxu0 %v1583_v56 }
 0x645   : > { %3001 = vmatmul.mubr.bf16.vlgmr.msra.gmra.mrb[32].mxu0 %v1584_v6 }
 0x646   : > { %v2974_v23 = vpop.f32.mrb[52].mxu1 }
 0x647   : > { %v1536_v8 = vpop.f32.mrb[53].mxu1 }
 0x648   : > { %v2975_v4 = vpop.f32.mrb[54].mxu1 }
 0x649   : > { %v1586_v29 = vpack.c.bf16 %v2975_v4, %v2974_v23  ;;  %v1539_v15 = vpop.f32.mrb[55].mxu1 }
 0x64a   : > { %v1585_v37 = vpack.c.bf16 %v1539_v15, %v1536_v8 }
 0x64c   : > { %3004 = vmatprep.mubr.bf16.mxu0 %v1585_v37 }
 0x64d   : > { %3005 = vmatmul.mubr.bf16.gmra.mrb[36].mxu0 %v1586_v29 }
 0x64e   : > { %v2978_v41 = vpop.f32.mrb[56].mxu1 }
 0x64f   : > { %v1552_v43 = vpop.f32.mrb[57].mxu1 }
 0x650   : > { %v2979_v44 = vpop.f32.mrb[58].mxu1 }
 0x651   : > { %v1588_v24 = vpack.c.bf16 %v2979_v44, %v2978_v41  ;;  %v1555_v47 = vpop.f32.mrb[59].mxu1 }
 0x652   : > { %v1587_v38 = vpack.c.bf16 %v1555_v47, %v1552_v43 }
 0x654   : > { %3008 = vmatprep.mubr.bf16.mxu0 %v1587_v38 }
 0x655   : > { %3009 = vmatmul.mubr.bf16.gmra.mrb[40].mxu0 %v1588_v24 }
 0x656   : > { %v2982_v49 = vpop.f32.mrb[60].mxu1 }
 0x657   : > { %v1568_v16 = vpop.f32.mrb[61].mxu1 }
 0x658   : > { %v2983_v59 = vpop.f32.mrb[62].mxu1 }
 0x659   : > { %v1590_v45 = vpack.c.bf16 %v2983_v59, %v2982_v49  ;;  %v1571_v30 = vpop.f32.mrb[63].mxu1 }
 0x65a   : > { %v1589_v40 = vpack.c.bf16 %v1571_v30, %v1568_v16 }
 0x65c   : > { %3012 = vmatprep.mubr.bf16.mxu0 %v1589_v40 }
 0x65d   : > { %3013 = vmatmul.mubr.bf16.gmra.mrb[44].mxu0 %v1590_v45 }
 0x65e   : > { %3032 = vmatprep.mubr.bf16.mxu0 %v3228_v21 }
 0x718   : > { %v3002_v32 = vpop.f32.mrb[32].mxu0 }
 0x719   : > { %v4325_v34 = vadd.f32 %v3002_v32, %v4214_v28  ;;  %v1625_v25 = vpop.f32.mrb[33].mxu0 }
 0x71a   : > { %v4328_v50 = vadd.f32 %v1625_v25, %v4220_v52  ;;  %v3003_v53 = vpop.f32.mrb[34].mxu0 }
 0x71b   : > { %v2594_v57 = vmul.f32 -1.442695, %v4325_v34  ;;  %v4332_v61 = vadd.f32 %v3003_v53, %v4217_v48  ;;  %v1628_v62 = vpop.f32.mrb[35].mxu0 }
 0x71c   : > { %v2592_v54 = vmul.f32 -1.442695, %v4328_v50  ;;  %v4336_v55 = vadd.f32 %v1628_v62, %v4223_v35 }
 0x71d   : > { %3320 = vpow2.f32 %v2594_v57  ;;  %v2595_v28 = vmul.f32 -1.442695, %v4332_v61 }
 0x71e   : > { %3322 = vpow2.f32 %v2592_v54  ;;  %v2593_v63 = vmul.f32 -1.442695, %v4336_v55 }
 0x71f   : > { %3324 = vpow2.f32 %v2595_v28 }
 0x720   : > { %3326 = vpow2.f32 %v2593_v63  ;;  %v3006_v52 = vpop.f32.mrb[36].mxu0 }
 0x721   : > { %v4341_v0 = vadd.f32 %v3006_v52, %v4230_v17  ;;  %v1641_v48 = vpop.f32.mrb[37].mxu0 }
 0x722   : > { %v4344_v9 = vadd.f32 %v1641_v48, %v4236_v27  ;;  %v3007_v1 = vpop.f32.mrb[38].mxu0 }
 0x723   : > { %v2598_v35 = vmul.f32 -1.442695, %v4341_v0  ;;  %v4348_v10 = vadd.f32 %v3007_v1, %v4233_v42  ;;  %v1644_v31 = vpop.f32.mrb[39].mxu0 }
 0x724   : > { %v2596_v33 = vmul.f32 -1.442695, %v4344_v9  ;;  %v4352_v3 = vadd.f32 %v1644_v31, %v4239_v51 }
 0x725   : > { %3328 = vpow2.f32 %v2598_v35  ;;  %v2599_v17 = vmul.f32 -1.442695, %v4348_v10 }
 0x726   : > { %3330 = vpow2.f32 %v2596_v33  ;;  %v2597_v11 = vmul.f32 -1.442695, %v4352_v3 }
 0x727   : > { %v3321_v27 = vpop.eup %3320  ;;  %3332 = vpow2.f32 %v2599_v17 }
 0x728   : > { %v3323_v39 = vpop.eup %3322  ;;  %v1738_v12 = vadd.f32 1.0, %v3321_v27  ;;  %3334 = vpow2.f32 %v2597_v11  ;;  %v3010_v5 = vpop.f32.mrb[40].mxu0 }
 0x729   : > { %v3325_v42 = vpop.eup %3324  ;;  %v1736_v7 = vadd.f32 1.0, %v3323_v39  ;;  %v4357_v18 = vadd.f32 %v3010_v5, %v4246_v58  ;;  %v1657_v13 = vpop.f32.mrb[41].mxu0 }
 0x72a   : > { %v3327_v51 = vpop.eup %3326  ;;  %3336 = vrcp.f32 %v1738_v12  ;;  %v1739_v14 = vadd.f32 1.0, %v3325_v42  ;;  %v4360_v6 = vadd.f32 %v1657_v13, %v4252_v36  ;;  %v3011_v26 = vpop.f32.mrb[42].mxu0 }
 0x72b   : > { %3338 = vrcp.f32 %v1736_v7  ;;  %v1737_v56 = vadd.f32 1.0, %v3327_v51  ;;  %v2602_v23 = vmul.f32 -1.442695, %v4357_v18  ;;  %v4364_v8 = vadd.f32 %v3011_v26, %v4249_v60  ;;  %v1660_v4 = vpop.f32.mrb[43].mxu0 }
 0x72c   : > { %3340 = vrcp.f32 %v1739_v14  ;;  %v2600_v58 = vmul.f32 -1.442695, %v4360_v6  ;;  %v4368_v29 = vadd.f32 %v1660_v4, %v4255_v2 }
 0x72d   : > { %3342 = vrcp.f32 %v1737_v56  ;;  %v2603_v15 = vmul.f32 -1.442695, %v4364_v8 }
 0x72e   : > { %3344 = vpow2.f32 %v2602_v23  ;;  %v2601_v36 = vmul.f32 -1.442695, %v4368_v29 }
 0x72f   : > { %v3329_v37 = vpop.eup %3328  ;;  %3346 = vpow2.f32 %v2600_v58 }
 0x730   : > { %v3331_v41 = vpop.eup %3330  ;;  %v1742_v43 = vadd.f32 1.0, %v3329_v37  ;;  %3348 = vpow2.f32 %v2603_v15  ;;  %v3014_v60 = vpop.f32.mrb[44].mxu0 }
 0x731   : > { %v3333_v44 = vpop.eup %3332  ;;  %v1740_v24 = vadd.f32 1.0, %v3331_v41  ;;  %3350 = vpow2.f32 %v2601_v36  ;;  %v4373_v47 = vadd.f32 %v3014_v60, %v4262_v20  ;;  %v1673_v2 = vpop.f32.mrb[45].mxu0 }
 0x732   : > { %v3335_v38 = vpop.eup %3334  ;;  %3352 = vrcp.f32 %v1742_v43  ;;  %v1743_v49 = vadd.f32 1.0, %v3333_v44  ;;  %v4376_v16 = vadd.f32 %v1673_v2, %v4268_v19  ;;  %v3015_v59 = vpop.f32.mrb[46].mxu0 }
 0x733   : > { %3354 = vrcp.f32 %v1740_v24  ;;  %v1741_v45 = vadd.f32 1.0, %v3335_v38  ;;  %v2606_v30 = vmul.f32 -1.442695, %v4373_v47  ;;  %v4380_v40 = vadd.f32 %v3015_v59, %v4265_v22  ;;  %v1676_v21 = vpop.f32.mrb[47].mxu0 }
 0x734   : > { %v3337_v32 = vpop.eup %3336  ;;  %3356 = vrcp.f32 %v1743_v49  ;;  %v2604_v20 = vmul.f32 -1.442695, %v4376_v16  ;;  %v4384_v25 = vadd.f32 %v1676_v21, %v4271_v46  ;;  %v3229_v21 = vld [vmem:[%s3957_s22 + $0x8] sm:$0xff]  }
 0x735   : > { %v3339_v53 = vpop.eup %3338  ;;  %3358 = vrcp.f32 %v1741_v45  ;;  %v2607_v19 = vmul.f32 -1.442695, %v4380_v40  ;;  %v1786_v22 = vmul.f32 %v3337_v32, %v4325_v34  ;;  %v3230_v32 = vld [vmem:[%s3957_s22 + $0x10] sm:$0xff]  }
 0x736   : > { %v3341_v57 = vpop.eup %3340  ;;  %3360 = vpow2.f32 %v2606_v30  ;;  %v2605_v62 = vmul.f32 -1.442695, %v4384_v25  ;;  %v1784_v52 = vmul.f32 %v3339_v53, %v4328_v50  ;;  %v3235_v53 = vld [vmem:[#allocation7 + $0x18] sm:$0xff]  }
 0x737   : > { %v3343_v54 = vpop.eup %3342  ;;  %v1787_v28 = vmul.f32 %v3341_v57, %v4332_v61  ;;  %3362 = vpow2.f32 %v2604_v20  ;;  %v3231_v20 = vld [vmem:[%s3957_s22 + $0x18] sm:$0xff]   ;;  %v3237_v57 = vld [vmem:[#allocation7 + $0x28] sm:$0xff]   ;;  %s2540_s22 = sshll.u32 %s3973_s21, 2 }
 0x738   : > { %v3345_v63 = vpop.eup %3344  ;;  %v1785_v46 = vmul.f32 %v3343_v54, %v4336_v55  ;;  %3364 = vpow2.f32 %v2607_v19  ;;  %v3236_v19 = vld [vmem:[#allocation7 + $0x20] sm:$0xff]   ;;  %s600_s3 = scalar_lea.vmem %s4549_s26, %s2540_s22  ;;  %s4552_s22 = sld [smem:[#allocation22_spill]] }
 0x739   : > { %v3347_v48 = vpop.eup %3346  ;;  %v1746_v1 = vadd.f32 1.0, %v3345_v63  ;;  %3366 = vpow2.f32 %v2605_v62  ;;  %v1809_v35 = vpack.c.bf16 %v1787_v28, %v1786_v22  ;;  %v3238_v62 = vld [vmem:[#allocation7 + $0x30] sm:$0xff]   ;;  %s2375_s26 = sshll.u32 %s586_s23, 4  ;;  %s4463_s26 = int_to_ptr.vmem [resolvable:$true] %s2375_s26 }
 0x73a   : > { %v3349_v31 = vpop.eup %3348  ;;  %v1744_v33 = vadd.f32 1.0, %v3347_v48  ;;  %v1808_v17 = vpack.c.bf16 %v1785_v46, %v1784_v52  ;;  %s3566_s17 = scalar_lea.vmem %s4463_s26, 128 }
 0x73b   : > { %v3351_v11 = vpop.eup %3350  ;;  %3368 = vrcp.f32 %v1746_v1  ;;  %v1747_v27 = vadd.f32 1.0, %v3349_v31  ;;  %p3567_p5 = scmp.ne.s32.totalorder %s4463_s26, %s3566_s17 }
 0x73c   : > { %v3353_v34 = vpop.eup %3352  ;;  %3370 = vrcp.f32 %v1744_v33  ;;  %v1745_v61 = vadd.f32 1.0, %v3351_v11  ;;  %3016 = vmatprep.subr.bf16.mxu0 %v1808_v17 }
 0x73d   : > { %v3355_v39 = vpop.eup %3354  ;;  %3372 = vrcp.f32 %v1747_v27  ;;  %3017 = vmatpush3.bf16.msra.mxu0 %v1808_v17  ;;  %v1790_v12 = vmul.f32 %v3353_v34, %v4341_v0  ;;  %p3568_p7 = pnand %p3567_p5, %p3898_p10 }
 0x73e   : > { %v3357_v50 = vpop.eup %3356  ;;  %3374 = vrcp.f32 %v1745_v61  ;;  %3018 = vmatprep.subr.bf16.mxu0 %v1809_v35  ;;  %v1788_v7 = vmul.f32 %v3355_v39, %v4344_v9 }
 0x73f   : > { %v3359_v55 = vpop.eup %3358  ;;  %v1791_v5 = vmul.f32 %v3357_v50, %v4348_v10  ;;  %p3569_p12 = pneg %p3568_p7 }
 0x740   : > { %v3361_v42 = vpop.eup %3360  ;;  %v1789_v13 = vmul.f32 %v3359_v55, %v4352_v3 }
 0x741   : > { %v3363_v51 = vpop.eup %3362  ;;  %v1750_v14 = vadd.f32 1.0, %v3361_v42  ;;  %3019 = vmatpush3.bf16.msra.mxu0 %v1809_v35  ;;  %v1811_v26 = vpack.c.bf16 %v1791_v5, %v1790_v12 }
 0x742   : > { %v3365_v56 = vpop.eup %3364  ;;  %v1748_v23 = vadd.f32 1.0, %v3363_v51  ;;  %v1810_v4 = vpack.c.bf16 %v1789_v13, %v1788_v7 }
 0x743   : > { %v3367_v58 = vpop.eup %3366  ;;  %3376 = vrcp.f32 %v1750_v14  ;;  %v1751_v15 = vadd.f32 1.0, %v3365_v56 }
 0x744   : > { %3378 = vrcp.f32 %v1748_v23  ;;  %v1749_v36 = vadd.f32 1.0, %v3367_v58  ;;  %3020 = vmatprep.subr.bf16.mxu0 %v1810_v4 }
 0x745   : > { %v3369_v0 = vpop.eup %3368  ;;  %3380 = vrcp.f32 %v1751_v15  ;;  %3021 = vmatpush3.bf16.msra.mxu0 %v1810_v4 }
 0x746   : > { %v3371_v10 = vpop.eup %3370  ;;  %3382 = vrcp.f32 %v1749_v36  ;;  %3022 = vmatprep.subr.bf16.mxu0 %v1811_v26  ;;  %v1794_v37 = vmul.f32 %v3369_v0, %v4357_v18 }
 0x747   : > { %v3373_v9 = vpop.eup %3372  ;;  %v1792_v43 = vmul.f32 %v3371_v10, %v4360_v6 }
 0x748   : > { %v3375_v3 = vpop.eup %3374  ;;  %v1795_v41 = vmul.f32 %v3373_v9, %v4364_v8 }
 0x749   : > { %v1793_v60 = vmul.f32 %v3375_v3, %v4368_v29  ;;  %3023 = vmatpush3.bf16.msra.mxu0 %v1811_v26 }
 0x74a   : > { %v1813_v44 = vpack.c.bf16 %v1795_v41, %v1794_v37 }
 0x74b   : > { %v1812_v24 = vpack.c.bf16 %v1793_v60, %v1792_v43 }
 0x74d   : > { %v3377_v2 = vpop.eup %3376  ;;  %3024 = vmatprep.subr.bf16.mxu0 %v1812_v24 }
 0x74e   : > { %v3379_v38 = vpop.eup %3378  ;;  %3025 = vmatpush3.bf16.msra.mxu0 %v1812_v24  ;;  %v1798_v18 = vmul.f32 %v3377_v2, %v4373_v47  ;;  %v3649_v47 = vmov 0.0  }
 0x74f   : > { %v3381_v49 = vpop.eup %3380  ;;  %3026 = vmatprep.subr.bf16.mxu0 %v1813_v44  ;;  %v1796_v6 = vmul.f32 %v3379_v38, %v4376_v16  ;;  %3052 = vmatprep.subr.bf16.mxu1 %v3649_v47  ;;  %v3232_v16 = vld [vmem:[#allocation7] sm:$0xff]  }
 0x750   : > { %v3383_v59 = vpop.eup %3382  ;;  %v1799_v8 = vmul.f32 %v3381_v49, %v4380_v40  ;;  %3068 = vmatprep.mubr.msk.bf16.mxu1 %vm3650_vm1, %v3649_v47  ;;  %3053 = vmatpush3.bf16.msra.mxu1 %v3232_v16  ;;  %v3233_v40 = vld [vmem:[#allocation7 + $0x8] sm:$0xff]  }
 0x751   : > { %v1797_v29 = vmul.f32 %v3383_v59, %v4384_v25  ;;  %3054 = vmatprep.subr.bf16.mxu1 %v3649_v47  ;;  %v3234_v25 = vld [vmem:[#allocation7 + $0x10] sm:$0xff]  }
 0x752   : > { %3027 = vmatpush3.bf16.msra.mxu0 %v1813_v44  ;;  %v1815_v45 = vpack.c.bf16 %v1799_v8, %v1798_v18 }
 0x753   : > { %v1814_v30 = vpack.c.bf16 %v1797_v29, %v1796_v6 }
 0x754   : > { %3055 = vmatpush3.bf16.msra.mxu1 %v3233_v40 }
 0x755   : > { %3028 = vmatprep.subr.bf16.mxu0 %v1814_v30  ;;  %3056 = vmatprep.subr.bf16.mxu1 %v3649_v47 }
 0x756   : > { %3029 = vmatpush3.bf16.msra.mxu0 %v1814_v30  ;;  %v1961_v30 = vld [vmem:[%s600_s3] sm:$0xf] }
 0x757   : > { %3030 = vmatprep.subr.bf16.mxu0 %v1815_v45 }
 0x758   : > { %3057 = vmatpush3.bf16.msra.mxu1 %v3234_v25 }
 0x759   : > { %3058 = vmatprep.subr.bf16.mxu1 %v3649_v47 }
 0x75a   : > { %3031 = vmatpush3.bf16.msra.mxu0 %v1815_v45 }
 0x75b   : > { %3040 = vmatprep.subr.bf16.mxu0 %v3649_v47 }
 0x75c   : > { %3059 = vmatpush3.bf16.msra.mxu1 %v3235_v53  ;;  %v3240_v53 = vld [vmem:[#allocation8] sm:$0xff]  }
 0x75d   : > { %3033 = vmatmul.mubr.bf16.vlgmr.msra.gmra.mrb[48].mxu0 %v3229_v21  ;;  %3060 = vmatprep.subr.bf16.mxu1 %v3649_v47  ;;  %v3239_v21 = vld [vmem:[#allocation7 + $0x38] sm:$0xff]  }
 0x75e   : > { %3036 = vmatprep.mubr.bf16.mxu0 %v3230_v32 }
 0x760   : > { %3061 = vmatpush3.bf16.msra.mxu1 %v3236_v19  ;;  %v3241_v19 = vld [vmem:[#allocation8 + $0x8] sm:$0xff]  }
 0x761   : > { %3062 = vmatprep.subr.bf16.mxu1 %v3649_v47 }
 0x764   : > { %3063 = vmatpush3.bf16.msra.mxu1 %v3237_v57  ;;  %v3242_v57 = vld [vmem:[#allocation8 + $0x10] sm:$0xff]  }
 0x765   : > { %3037 = vmatmul.mubr.bf16.gmra.mrb[52].mxu0 %v3231_v20  ;;  %3064 = vmatprep.subr.bf16.mxu1 %v3649_v47 }
 0x766   : > { %3048 = vmatprep.mubr.msk.bf16.mxu0 %vm3650_vm1, %v3649_v47 }
 0x768   : > { %3065 = vmatpush3.bf16.msra.mxu1 %v3238_v62  ;;  %v3243_v62 = vld [vmem:[#allocation8 + $0x18] sm:$0xff]  }
 0x769   : > { %3066 = vmatprep.subr.bf16.mxu1 %v3649_v47 }
 0x76c   : > { %3067 = vmatpush3.bf16.msra.mxu1 %v3239_v21 }
 0x76d   : > { %3092 = vmatprep.subr.bf16.mxu1 %v3649_v47 }
 0x830   : > { %v3034_v54 = vpop.f32.mrb[48].mxu0 }
 0x831   : > { %v2614_v22 = vmul.f32 -1.442695, %v3034_v54  ;;  %v1874_v28 = vpop.f32.mrb[49].mxu0 }
 0x832   : > { %v2612_v63 = vmul.f32 -1.442695, %v1874_v28  ;;  %v3035_v52 = vpop.f32.mrb[50].mxu0 }
 0x833   : > { %3384 = vpow2.f32 %v2614_v22  ;;  %v2615_v46 = vmul.f32 -1.442695, %v3035_v52  ;;  %v1877_v48 = vpop.f32.mrb[51].mxu0  ;;  %v3245_v22 = vld [vmem:[#allocation8 + $0x28] sm:$0xff]  }
 0x834   : > { %3386 = vpow2.f32 %v2612_v63  ;;  %v2613_v1 = vmul.f32 -1.442695, %v1877_v48  ;;  %v3247_v63 = vld [vmem:[#allocation8 + $0x38] sm:$0xff]  }
 0x835   : > { %3388 = vpow2.f32 %v2615_v46 }
 0x836   : > { %3390 = vpow2.f32 %v2613_v1 }
 0x838   : > { %v3038_v35 = vpop.f32.mrb[52].mxu0 }
 0x839   : > { %v2618_v31 = vmul.f32 -1.442695, %v3038_v35  ;;  %v1890_v33 = vpop.f32.mrb[53].mxu0 }
 0x83a   : > { %v2616_v17 = vmul.f32 -1.442695, %v1890_v33  ;;  %v3039_v11 = vpop.f32.mrb[54].mxu0 }
 0x83b   : > { %3392 = vpow2.f32 %v2618_v31  ;;  %v2619_v27 = vmul.f32 -1.442695, %v3039_v11  ;;  %v1893_v34 = vpop.f32.mrb[55].mxu0 }
 0x83c   : > { %3394 = vpow2.f32 %v2616_v17  ;;  %v2617_v61 = vmul.f32 -1.442695, %v1893_v34 }
 0x83d   : > { %v3385_v39 = vpop.eup %3384  ;;  %3396 = vpow2.f32 %v2619_v27 }
 0x83e   : > { %v3387_v50 = vpop.eup %3386  ;;  %v1931_v55 = vadd.f32 1.0, %v3385_v39  ;;  %3398 = vpow2.f32 %v2617_v61  ;;  %v3248_v39 = vld [vmem:[#allocation10] sm:$0xff]  }
 0x83f   : > { %v3389_v12 = vpop.eup %3388  ;;  %v1929_v5 = vadd.f32 1.0, %v3387_v50  ;;  %v3249_v50 = vld [vmem:[#allocation10 + $0x8] sm:$0xff]  }
 0x840   : > { %v3391_v42 = vpop.eup %3390  ;;  %3400 = vrcp.f32 %v1931_v55  ;;  %v1932_v7 = vadd.f32 1.0, %v3389_v12  ;;  %v3250_v55 = vld [vmem:[#allocation10 + $0x10] sm:$0xff]   ;;  %v3251_v12 = vld [vmem:[#allocation10 + $0x18] sm:$0xff]  }
 0x841   : > { %3402 = vrcp.f32 %v1929_v5  ;;  %v1930_v13 = vadd.f32 1.0, %v3391_v42  ;;  %v3252_v5 = vld [vmem:[#allocation10 + $0x20] sm:$0xff]   ;;  %v3253_v42 = vld [vmem:[#allocation10 + $0x28] sm:$0xff]  }
 0x842   : > { %3404 = vrcp.f32 %v1932_v7  ;;  %v3254_v7 = vld [vmem:[#allocation10 + $0x30] sm:$0xff]  }
 0x843   : > { %3406 = vrcp.f32 %v1930_v13  ;;  %v3255_v13 = vld [vmem:[#allocation10 + $0x38] sm:$0xff]  }
 0x845   : > { %v3393_v51 = vpop.eup %3392 }
 0x846   : > { %v3395_v14 = vpop.eup %3394  ;;  %v1935_v26 = vadd.f32 1.0, %v3393_v51  ;;  %v2631_v51 = vld [vmem:[%s4551_s27] ss:$0 sm:$0xff]  ;;  %s3570_s27 = sshll.u32 %s3651_s14, 4  ;;  %s3571_s27 = int_to_ptr.vmem [resolvable:$false] %s3570_s27 }
 0x847   : > { %v3397_v56 = vpop.eup %3396  ;;  %v1933_v23 = vadd.f32 1.0, %v3395_v14  ;;  %s3572_s28 = scalar_lea.vmem %s3571_s27, 256  ;;  %p3573_p1 = scmp.lt.s32.totalorder %s4463_s26, %s3571_s27 }
 0x848   : > { %v3399_v4 = vpop.eup %3398  ;;  %3408 = vrcp.f32 %v1935_v26  ;;  %v1936_v58 = vadd.f32 1.0, %v3397_v56  ;;  %p3574_p2 = scmp.lt.s32.totalorder %s3572_s28, %s3566_s17 }
 0x849   : > { %3410 = vrcp.f32 %v1933_v23  ;;  %v1934_v15 = vadd.f32 1.0, %v3399_v4 }
 0x84a   : > { %v3401_v36 = vpop.eup %3400  ;;  %3412 = vrcp.f32 %v1936_v58  ;;  %p3575_p13 = por %p3574_p2, %p3573_p1 }
 0x84b   : > { %v3403_v0 = vpop.eup %3402  ;;  %3414 = vrcp.f32 %v1934_v15  ;;  %v1955_v3 = vmul.f32 %v3401_v36, %v3034_v54  ;;  %v3244_v54 = vld [vmem:[#allocation8 + $0x20] sm:$0xff]  }
 0x84c   : > { %v3405_v10 = vpop.eup %3404  ;;  %v1953_v41 = vmul.f32 %v3403_v0, %v1874_v28  ;;  %v3246_v28 = vld [vmem:[#allocation8 + $0x30] sm:$0xff]   ;;  %p3576_p9 = pnand %p3575_p13, %p3569_p12 }
 0x84d   : > { %v3407_v9 = vpop.eup %3406  ;;  %v1956_v37 = vmul.f32 %v3405_v10, %v3035_v52  ;;  %v2621_v52 = vld [vmem:[%s4550_s25] ss:$0 sm:$0xff]  ;;  %s4461_s25 = scalar_lea.hbm %s4553_s24, %s2651_s20 }
 0x84e   : > { %v1954_v43 = vmul.f32 %v3407_v9, %v1877_v48  ;;  %v2641_v9 = vld [vmem:[%s4552_s22] ss:$0 sm:$0xff] }
 0x84f   : > { %v1963_v60 = vpack.c.bf16 %v1956_v37, %v1955_v3 }
 0x850   : > { %v1962_v44 = vpack.c.bf16 %v1954_v43, %v1953_v41 }
 0x852   : > { %v3409_v24 = vpop.eup %3408  ;;  %3041 = vmatpush3.bf16.msra.mxu0 %v1962_v44 }
 0x853   : > { %v3411_v2 = vpop.eup %3410  ;;  %3042 = vmatprep.subr.bf16.mxu0 %v3649_v47  ;;  %v1959_v59 = vmul.f32 %v3409_v24, %v3038_v35 }
 0x854   : > { %v3413_v38 = vpop.eup %3412  ;;  %v1957_v8 = vmul.f32 %v3411_v2, %v1890_v33 }
 0x855   : > { %v3415_v49 = vpop.eup %3414  ;;  %v1960_v18 = vmul.f32 %v3413_v38, %v3039_v11 }
 0x856   : > { %v1958_v6 = vmul.f32 %v3415_v49, %v1893_v34  ;;  %3043 = vmatpush3.bf16.msra.mxu0 %v1963_v60 }
 0x857   : > { %v1965_v29 = vpack.c.bf16 %v1960_v18, %v1959_v59  ;;  %3044 = vmatprep.subr.bf16.mxu0 %v3649_v47 }
 0x858   : > { %v1964_v45 = vpack.c.bf16 %v1958_v6, %v1957_v8 }
 0x85a   : > { %3045 = vmatpush3.bf16.msra.mxu0 %v1964_v45 }
 0x85b   : > { %3046 = vmatprep.subr.bf16.mxu0 %v3649_v47 }
 0x85e   : > { %3047 = vmatpush3.bf16.msra.mxu0 %v1965_v29 }
 0x85f   : > { %3072 = vmatprep.subr.bf16.mxu0 %v3649_v47 }
 0x861   : > { %3049 = vmatmul.mubr.msk.bf16.vlgmr.msra.gmra.mrb[56].mxu0 %vm1966_vm2, %v1961_v30 }
 0x862   : > { %3088 = vmatprep.mubr.msk.bf16.mxu0 %vm3650_vm1, %v3649_v47  ;;  %3073 = vmatpush3.bf16.msra.mxu0 %v3240_v53 }
 0x863   : > { %3074 = vmatprep.subr.bf16.mxu0 %v3649_v47 }
 0x866   : > { %3075 = vmatpush3.bf16.msra.mxu0 %v3241_v19 }
 0x867   : > { %3076 = vmatprep.subr.bf16.mxu0 %v3649_v47 }
 0x86a   : > { %3077 = vmatpush3.bf16.msra.mxu0 %v3242_v57 }
 0x86b   : > { %3078 = vmatprep.subr.bf16.mxu0 %v3649_v47 }
 0x86e   : > { %3079 = vmatpush3.bf16.msra.mxu0 %v3243_v62 }
 0x86f   : > { %3080 = vmatprep.subr.bf16.mxu0 %v3649_v47 }
 0x872   : > { %3081 = vmatpush3.bf16.msra.mxu0 %v3244_v54 }
 0x873   : > { %3082 = vmatprep.subr.bf16.mxu0 %v3649_v47 }
 0x876   : > { %3083 = vmatpush3.bf16.msra.mxu0 %v3245_v22 }
 0x877   : > { %3084 = vmatprep.subr.bf16.mxu0 %v3649_v47 }
 0x87a   : > { %3085 = vmatpush3.bf16.msra.mxu0 %v3246_v28 }
 0x87b   : > { %3086 = vmatprep.subr.bf16.mxu0 %v3649_v47 }
 0x87e   : > { %3087 = vmatpush3.bf16.msra.mxu0 %v3247_v63 }
 0x934   : > { %v2004_v32 = vpop.f32.mrb[56].mxu0 }
 0x935   : > { %v2026_v20 = vpack.c.bf16 %v2004_v32, %v2004_v32  ;;  %v3050_v16 = vpop.f32.mrb[57].mxu0 }
 0x936   : > { %v2007_v40 = vpop.f32.mrb[58].mxu0 }
 0x937   : > { %v3051_v25 = vpop.f32.mrb[59].mxu0  ;;  %3069 = vmatmul.mubr.bf16.vlgmr.msra.gmra.mrb[64].mxu1 %v2026_v20 }
 0x938   : > { %3108 = vmatprep.mubr.msk.bf16.mxu1 %vm3650_vm1, %v3649_v47  ;;  %3093 = vmatpush3.bf16.msra.mxu1 %v3248_v39 }
 0x939   : > { %3094 = vmatprep.subr.bf16.mxu1 %v3649_v47 }
 0x93c   : > { %3095 = vmatpush3.bf16.msra.mxu1 %v3249_v50 }
 0x93d   : > { %3096 = vmatprep.subr.bf16.mxu1 %v3649_v47 }
 0x940   : > { %3097 = vmatpush3.bf16.msra.mxu1 %v3250_v55 }
 0x941   : > { %3098 = vmatprep.subr.bf16.mxu1 %v3649_v47 }
 0x944   : > { %3099 = vmatpush3.bf16.msra.mxu1 %v3251_v12 }
 0x945   : > { %3100 = vmatprep.subr.bf16.mxu1 %v3649_v47 }
 0x948   : > { %3101 = vmatpush3.bf16.msra.mxu1 %v3252_v5 }
 0x949   : > { %3102 = vmatprep.subr.bf16.mxu1 %v3649_v47 }
 0x94c   : > { %3103 = vmatpush3.bf16.msra.mxu1 %v3253_v42 }
 0x94d   : > { %3104 = vmatprep.subr.bf16.mxu1 %v3649_v47 }
 0x950   : > { %3105 = vmatpush3.bf16.msra.mxu1 %v3254_v7 }
 0x951   : > { %3106 = vmatprep.subr.bf16.mxu1 %v3649_v47 }
 0x954   : > { %3107 = vmatpush3.bf16.msra.mxu1 %v3255_v13 }
 0xa0a   : > { %v2116_v46 = vpop.f32.mrb[64].mxu1 }
 0xa0b   : > { %v2117_v48 = vadd.f32 %v2621_v52, %v2116_v46  ;;  %v3070_v1 = vpop.f32.mrb[65].mxu1 }
 0xa0c   : > { %v2119_v35 = vpop.f32.mrb[66].mxu1 }
 0xa0d   : > { %v2630_v31 = vmul.f32 -1.442695, %v2117_v48  ;;  %v3071_v33 = vpop.f32.mrb[67].mxu1 }
 0xa0f   : > { %3416 = vpow2.f32 %v2630_v31 }
 0xa19   : > { %v3417_v17 = vpop.eup %3416 }
 0xa1a   : > { %v2125_v11 = vadd.f32 1.0, %v3417_v17 }
 0xa1c   : > { %3418 = vrcp.f32 %v2125_v11 }
 0xa26   : > { %v3419_v27 = vpop.eup %3418 }
 0xa27   : > { %v2128_v34 = vmul.f32 %v3419_v27, %v2117_v48 }
 0xa29   : > { %v2145_v61 = vpack.c.bf16 %v2128_v34, %v2128_v34 }
 0xa2b   : > { %3089 = vmatmul.mubr.bf16.vlgmr.msra.gmra.mrb[60].mxu0 %v2145_v61 }
 0xafe   : > { %v2235_v14 = vpop.f32.mrb[60].mxu0 }
 0xaff   : > { %v2236_v26 = vadd.f32 %v2631_v51, %v2235_v14  ;;  %v3090_v56 = vpop.f32.mrb[61].mxu0 }
 0xb00   : > { %v2238_v23 = vpop.f32.mrb[62].mxu0 }
 0xb01   : > { %v2640_v4 = vmul.f32 -1.442695, %v2236_v26  ;;  %v3091_v58 = vpop.f32.mrb[63].mxu0 }
 0xb03   : > { %3420 = vpow2.f32 %v2640_v4 }
 0xb0d   : > { %v3421_v15 = vpop.eup %3420 }
 0xb0e   : > { %v2244_v36 = vadd.f32 1.0, %v3421_v15 }
 0xb10   : > { %3422 = vrcp.f32 %v2244_v36 }
 0xb1a   : > { %v3423_v0 = vpop.eup %3422 }
 0xb1b   : > { %v2247_v47 = vmul.f32 %v3423_v0, %v2236_v26 }
 0xb1d   : > { %v2264_v10 = vpack.c.bf16 %v2247_v47, %v2247_v47 }
 0xb1f   : > { %3109 = vmatmul.mubr.bf16.vlgmr.msra.gmra.mrb[68].mxu1 %v2264_v10 }
 0xbf2   : > { %v2354_v3 = vpop.f32.mrb[68].mxu1 }
 0xbf3   : > { %v2355_v37 = vadd.f32 %v2641_v9, %v2354_v3  ;;  %v3110_v41 = vpop.f32.mrb[69].mxu1 }
 0xbf4   : > { %v2357_v43 = vpop.f32.mrb[70].mxu1 }
 0xbf5   : > { %2360 = vst [vmem:[%s586_s23] sm:$0xff] %v2355_v37  ;;  %v3111_v60 = vpop.f32.mrb[71].mxu1 }
 0xbf6   : > { %3579 = shalt.err (!%p3576_p9)
}
 0xbf7   : > { %s3580_s7 = scalar_lea.hbm %s4461_s25, 128  ;;  %s3584_s22 = scalar_lea.hbm %s4553_s24, 256 }
 0xbf8   : > { %p3581_p0 = scmp.ne.s32.totalorder %s4461_s25, %s3580_s7  ;;  %p3585_p8 = scmp.lt.u32.totalorder %s4461_s25, %s4553_s24 }
 0xbf9   : > { %p3586_p6 = scmp.lt.u32.totalorder %s3584_s22, %s3580_s7  ;;  %p3588_p5 = scmp.lt.u32.totalorder %s3580_s7, %s4461_s25 }
 0xbfa   : > { %p3582_p11 = pnand %p3581_p0, %p3898_p10 }
 0xbfb   : > { %p3587_p3 = por %p3586_p6, %p3585_p8 }
 0xbfc   : > { %p3583_p4 = pneg %p3582_p11 }
 0xbfd   : > { %p3589_p7 = por %p3588_p5, %p3587_p3 }
 0xbff   : > { %p3590_p12 = pnand %p3589_p7, %p3583_p4 }
 0xc01   : > { %3593 = shalt.err (!%p3590_p12)
}
 0xc02   : > { %3130 = dma.vmem_to_hbm [thread:$0]  (%p3898_p10), %s4463_s26, 128, %s4461_s25, %s2362_s9  }
 0xc03 PF: > { %s4554_s3 = sld [smem:[#allocation16_spill]]  ;;  %s4555_s21 = sld [smem:[#allocation17_spill]] }
 0xc04   : > { %p4557_p2 = scmp.ge.s32.totalorder %s3640_s16, 2 }
 0xc09   : > { %s2387_s17 = sand.u32 1, %s4554_s3   ;;  %p4556_p1 = scmp.ne.s32.totalorder %s4555_s21, 0 }
 0xc0a   : > { %s2388_s14 = scalar_lea.sflag [#allocation4], %s2387_s17 }
 0xc0b   : > { %p3150_p13 = pnand %p4557_p2, %p4556_p1 }
 0xc0d   : > { %3623 = dma.done.wait (!%p3150_p13), %s2388_s14, 128  }
 0xc0e   : > { %3625 = vsyncadd (!%p3150_p13), %s2388_s14, 4294967168  ;;  %p29_p9 = scmp.ge.s32.totalorder %s3888_s13, 4   ;;  %s4558_s29 = smov %s3632_s30 }
 0xc0f   : > { %s4559_s30 = smov %s3636_s15  ;;  %s4560_s15 = smov %s3904_s18 }
 0xc10   : > { %s4561_s16 = smov %s3888_s13  ;;  %31 = sbr.rel (!%p29_p9) target bundleno = 14 (0xe), region = 146 }
 0xc17   :  { %2393 = vsyncpa [#allocation3], 1 }
 0xc18   :  { %2395 = vsyncpa [#allocation3 + $0x1], 1 }
 0xc19   :  { %2396 = vsyncpa [#allocation6], 1 }
 0xc1a   :  { %2397 = vsyncpa [#allocation9], 1 }
 0xc1b   :  { %2398 = vsyncpa [#allocation4], 1 }
 0xc1c   :  { %2400 = vsyncpa [#allocation4 + $0x1], 1 }

</bundles_post_ra>
